<compile_context>
chip_gen: v5e
topology: v5e:2x2
jax: 0.10.0
libtpu: 0.0.40
codegen_flags: <defaults>
</compile_context>

<pallas_src>
import functools

import jax
import jax.numpy as jnp
from jax import lax
from jax.experimental import pallas as pl
from jax.experimental.pallas import tpu as pltpu


def _erf(z):
    # Abramowitz & Stegun 7.1.26 polynomial erf, |err| < 1.5e-7 (~ f32 eps).
    a1, a2, a3, a4, a5 = (0.254829592, -0.284496736, 1.421413741,
                          -1.453152027, 1.061405429)
    p = 0.3275911
    s = jnp.where(z >= 0.0, 1.0, -1.0)
    az = jnp.abs(z)
    d = 1.0 + p * az
    # EUP approx reciprocal (~2^-12 rel err) + one Newton step -> ~f32 accuracy.
    t0 = pl.reciprocal(d, approx=True)
    t = t0 * (2.0 - d * t0)
    poly = ((((a5 * t + a4) * t + a3) * t + a2) * t + a1) * t
    return s * (1.0 - poly * jnp.exp(-az * az))


def _gelu_exact(x):
    # nn.GELU default (erf-based, not tanh approximation).
    return 0.5 * x * (1.0 + _erf(x * 0.7071067811865476))


def ffn_kernel(x_ref, w1_ref, b1_ref, wdw_ref, bdw_ref, w2_ref, b2_ref, o_ref,
               *, H, W, hid):
    # x_ref:   (B*H, W*Cin)   fused-lane rows of one block of B whole images
    # w1_ref:  (W*Cin, W*hid) block-diag pointwise1     b1_ref:  (1, W*hid)
    # wdw_ref: (9, W*hid)     tiled depthwise taps (row = 3*dy + dx)
    # bdw_ref: (1, W*hid)
    # w2_ref:  (W*hid, W*Cout) block-diag pointwise2    b2_ref:  (1, W*Cout)
    # o_ref:   (B*H, W*Cout)  lane-dense output block
    f32 = jnp.float32
    rows = x_ref.shape[0]
    lanes = W * hid

    # ---- pointwise1: 1x1 conv == fused-lane matmul on the MXU ----
    h = jnp.dot(x_ref[...], w1_ref[...], preferred_element_type=f32)
    h = h + b1_ref[...]

    # ---- depthwise 3x3, stride 1, padding 1 (groups == hid) ----
    # dx taps: lane roll (XLU) + lane-boundary mask + per-channel madd (VPU).
    # dy taps: sublane roll (XLU) + image-edge row mask.
    lane_id = lax.broadcasted_iota(jnp.int32, (rows, lanes), 1)
    row_id = lax.broadcasted_iota(jnp.int32, (rows, lanes), 0)
    y = row_id % H                                   # row within its image
    zero = jnp.zeros_like(h)

    left_valid = lane_id >= hid                      # x-1 exists (w > 0)
    right_valid = lane_id < (W - 1) * hid            # x+1 exists (w < W-1)
    wdw = wdw_ref[...]                               # (9, W*hid)

    def hsum(dy):
        # sum over dx of the lane-shifted h times wdw[dy, dx, :] (tiled).
        acc = h * wdw[3 * dy + 1:3 * dy + 2, :]                       # dx = 1
        left = pltpu.roll(h, shift=hid, axis=1)                       # dx = 0
        acc = acc + jnp.where(left_valid, left, zero) * wdw[3 * dy:3 * dy + 1, :]
        right = pltpu.roll(h, shift=lanes - hid, axis=1)              # dx = 2
        acc = acc + jnp.where(right_valid, right, zero) * wdw[3 * dy + 2:3 * dy + 3, :]
        return acc

    acc = hsum(1) + bdw_ref[...]                      # center tap + bias
    top = pltpu.roll(hsum(0), shift=1, axis=0)        # needs row y-1
    acc = acc + jnp.where(y > 0, top, zero)
    bot = pltpu.roll(hsum(2), shift=rows - 1, axis=0)  # needs row y+1
    acc = acc + jnp.where(y < H - 1, bot, zero)

    # ---- GELU (exact/erf variant, matches nn.GELU()) ----
    g = _gelu_exact(acc)

    # ---- pointwise2: 1x1 conv; full-128-lane store ----
    out = jnp.dot(g, w2_ref[...], preferred_element_type=f32) + b2_ref[...]
    o_ref[...] = out.astype(o_ref.dtype)


# ---------------- wrapper-side (one-time) weight expansion ----------------

def _block_diag_pointwise(w, W):
    # w: (Cin, Cout) -> (W*Cin, W*Cout); block (x, y) == w iff x == y.
    Cin, Cout = w.shape
    eye = jnp.eye(W, dtype=w.dtype)
    return jnp.einsum('xy,cd->xcyd', eye, w).reshape(W * Cin, W * Cout)


def ffn_prepare(w1, b1, wdw, bdw, w2, b2, *, W):
    """Expand parameters once per parameter set; reuse across forward calls."""
    hid = w1.shape[1]
    w1e = _block_diag_pointwise(w1, W)                 # (W*Cin, W*hid)
    w2e = _block_diag_pointwise(w2, W)                 # (W*hid, W*Cout)
    wdwt = jnp.tile(wdw.reshape(9, hid), (1, W))       # (9, W*hid), lane w*hid+c -> wdw[dy,dx,c]
    b1t = jnp.tile(b1, W)[None, :]                     # (1, W*hid)
    bdwt = jnp.tile(bdw, W)[None, :]                   # (1, W*hid)
    b2t = jnp.tile(b2, W)[None, :]                     # (1, W*Cout)
    return (w1e, b1t, wdwt, bdwt, w2e, b2t)


def ffn_pallas(x_nhwc, w1, b1, wdw, bdw, w2, b2, *, block_n=None, params=None):
    """x_nhwc: (N, H, W, Cin) float32. Returns (N, H, W, Cout) float32."""
    N, H, W, Cin = x_nhwc.shape
    hid = w1.shape[1]
    Cout = w2.shape[1]

    # The fused-lane layout relies on full 128-lane rows; assert explicitly.
    assert (W * Cin) % 128 == 0, "W*Cin must be a multiple of 128"
    assert (W * hid) % 128 == 0, "W*hid must be a multiple of 128"
    assert (W * Cout) % 128 == 0, "W*Cout must be a multiple of 128"

    if block_n is None:
        # grid=(1,): single-TC chips see the grid as a serial loop, so splitting
        # only adds ~0.35us/step overhead; on v7x a split would re-fetch the
        # invariant weights per core.  For large N, pass block_n so that
        # block_n*H >= 128/256 and is a multiple of 8.
        block_n = N
    assert N % block_n == 0, "N must be divisible by block_n"
    grid_n = N // block_n
    rows_blk = block_n * H
    assert rows_blk % 8 == 0 or grid_n == 1, "row block must be sublane aligned"

    if params is None:
        params = ffn_prepare(w1, b1, wdw, bdw, w2, b2, W=W)
    w1e, b1t, wdwt, bdwt, w2e, b2t = params

    x_rows = x_nhwc.reshape(N * H, W * Cin)            # lane = w*Cin + c

    kernel = functools.partial(ffn_kernel, H=H, W=W, hid=hid)

    # TODO(synk): when grid_n > 1, mark the grid-invariant weight inputs
    # single-buffered (pipeline_mode=pl.Buffered(1)) to halve their VMEM
    # residency; irrelevant for the default grid=(1,).
    grid_spec = pltpu.PrefetchScalarGridSpec(
        num_scalar_prefetch=0,
        grid=(grid_n,),
        in_specs=[
            pl.BlockSpec((rows_blk, W * Cin), lambda n: (n, 0)),
            pl.BlockSpec((W * Cin, W * hid), lambda n: (0, 0)),
            pl.BlockSpec((1, W * hid), lambda n: (0, 0)),
            pl.BlockSpec((9, W * hid), lambda n: (0, 0)),
            pl.BlockSpec((1, W * hid), lambda n: (0, 0)),
            pl.BlockSpec((W * hid, W * Cout), lambda n: (0, 0)),
            pl.BlockSpec((1, W * Cout), lambda n: (0, 0)),
        ],
        out_specs=pl.BlockSpec((rows_blk, W * Cout), lambda n: (n, 0)),
    )
    out_rows = pl.pallas_call(
        kernel,
        out_shape=jax.ShapeDtypeStruct((N * H, W * Cout), jnp.float32),
        grid_spec=grid_spec,
        compiler_params=pltpu.CompilerParams(
            dimension_semantics=("parallel",)),
    )(x_rows, w1e, b1t, wdwt, bdwt, w2e, b2t)

    return out_rows.reshape(N, H, W, Cout)


def ffn_reference(x_nhwc, w1, b1, wdw, bdw, w2, b2):
    """Pure-JAX reference of the PyTorch FFN forward (NHWC layout)."""
    N, H, W, _ = x_nhwc.shape
    h = jnp.einsum('nhwc,cd->nhwd', x_nhwc, w1) + b1
    hp = jnp.pad(h, ((0, 0), (1, 1), (1, 1), (0, 0)))
    acc = jnp.zeros_like(h)
    for dy in range(3):
        for dx in range(3):
            acc = acc + hp[:, dy:dy + H, dx:dx + W, :] * wdw[dy, dx]
    acc = acc + bdw
    g = jax.nn.gelu(acc, approximate=False)
    return jnp.einsum('nhwd,de->nhwe', g, w2) + b2


if __name__ == "__main__":
    # Shapes implied by the module: in_features=16, hidden_features=32,
    # out_features defaults to in_features=16; batch=4, spatial 8x8.
    # (W*Cin = W*Cout = 128 and W*hid = 256 -> lane-dense fused layout.)
    N, Cin, H, W = 4, 16, 8, 8
    hid, Cout = 32, 16

    key = jax.random.PRNGKey(0)
    kx, k1, kb1, kdw, kbdw, k2, kb2 = jax.random.split(key, 7)

    # PyTorch-style NCHW input, transposed to the kernel's NHWC layout.
    x_nchw = jax.random.normal(kx, (N, Cin, H, W), dtype=jnp.float32)
    x_nhwc = jnp.transpose(x_nchw, (0, 2, 3, 1))

    # Deterministic synthetic parameters (equivalent to the nn.Conv2d weights:
    # pointwise W1 = conv.weight[:, :, 0, 0].T, depthwise wdw = weight[c,0,:,:]).
    w1 = 0.1 * jax.random.normal(k1, (Cin, hid), dtype=jnp.float32)
    b1 = 0.1 * jax.random.normal(kb1, (hid,), dtype=jnp.float32)
    wdw = 0.1 * jax.random.normal(kdw, (3, 3, hid), dtype=jnp.float32)
    bdw = 0.1 * jax.random.normal(kbdw, (hid,), dtype=jnp.float32)
    w2 = 0.1 * jax.random.normal(k2, (hid, Cout), dtype=jnp.float32)
    b2 = 0.1 * jax.random.normal(kb2, (Cout,), dtype=jnp.float32)

    # Expand parameters once (re-usable across calls), then run the kernel.
    params = ffn_prepare(w1, b1, wdw, bdw, w2, b2, W=W)
    out = ffn_pallas(x_nhwc, w1, b1, wdw, bdw, w2, b2, params=params)
    out = jax.block_until_ready(out)

    ref = ffn_reference(x_nhwc, w1, b1, wdw, bdw, w2, b2)
    assert out.shape == (N, H, W, Cout)
    assert jnp.allclose(out, ref, atol=1e-4, rtol=1e-4), \
        f"max abs err {jnp.max(jnp.abs(out - ref))}"

    print("KERNEL_OK")
</pallas_src>

<mosaic_0001>
module attributes {stable_mosaic.version = 11 : i64} {
  func.func @ffn_kernel(%arg0: i32, %arg1: memref<32x128xf32, #tpu.memory_space<vmem>>, %arg2: memref<128x256xf32, #tpu.memory_space<vmem>>, %arg3: memref<1x256xf32, #tpu.memory_space<vmem>>, %arg4: memref<9x256xf32, #tpu.memory_space<vmem>>, %arg5: memref<1x256xf32, #tpu.memory_space<vmem>>, %arg6: memref<256x128xf32, #tpu.memory_space<vmem>>, %arg7: memref<1x128xf32, #tpu.memory_space<vmem>>, %arg8: memref<32x128xf32, #tpu.memory_space<vmem>>) attributes {dimension_semantics = [#tpu.dimension_semantics<parallel>], iteration_bounds = array<i64: 1>, scalar_prefetch = 0 : i64, scratch_operands = 0 : i64, tpu.core_type = #tpu.core_type<tc>, window_params = [{transform_indices = @transform_0, window_bounds = array<i64: 32, 128>}, {pipeline_mode = #tpu.pipeline_mode<synchronous>, transform_indices = @transform_1, window_bounds = array<i64: 128, 256>}, {pipeline_mode = #tpu.pipeline_mode<synchronous>, transform_indices = @transform_2, window_bounds = array<i64: 1, 256>}, {pipeline_mode = #tpu.pipeline_mode<synchronous>, transform_indices = @transform_3, window_bounds = array<i64: 9, 256>}, {pipeline_mode = #tpu.pipeline_mode<synchronous>, transform_indices = @transform_4, window_bounds = array<i64: 1, 256>}, {pipeline_mode = #tpu.pipeline_mode<synchronous>, transform_indices = @transform_5, window_bounds = array<i64: 256, 128>}, {pipeline_mode = #tpu.pipeline_mode<synchronous>, transform_indices = @transform_6, window_bounds = array<i64: 1, 128>}, {transform_indices = @transform_7, window_bounds = array<i64: 32, 128>}]} {
    %c0 = arith.constant 0 : index
    %c0_0 = arith.constant 0 : index
    %0 = vector.load %arg1[%c0, %c0_0] : memref<32x128xf32, #tpu.memory_space<vmem>>, vector<32x128xf32>
    %c0_1 = arith.constant 0 : index
    %c0_2 = arith.constant 0 : index
    %1 = vector.load %arg2[%c0_1, %c0_2] : memref<128x256xf32, #tpu.memory_space<vmem>>, vector<128x256xf32>
    %cst = arith.constant dense<0.000000e+00> : vector<32x256xf32>
    %2 = tpu.matmul %0, %1, %cst {dimension_numbers = #tpu.dot_dimension_numbers<[1], [0], [0], [1], [0, 0, 1, 1], [], []>} : vector<32x128xf32>, vector<128x256xf32>, vector<32x256xf32> -> vector<32x256xf32>
    %c0_3 = arith.constant 0 : index
    %c0_4 = arith.constant 0 : index
    %3 = vector.load %arg3[%c0_3, %c0_4] : memref<1x256xf32, #tpu.memory_space<vmem>>, vector<1x256xf32>
    %4 = vector.broadcast %3 : vector<1x256xf32> to vector<32x256xf32>
    %5 = arith.addf %2, %4 : vector<32x256xf32>
    %6 = tpu.iota {dimensions = array<i32: 1>} : vector<32x256xi32>
    %7 = tpu.iota {dimensions = array<i32: 0>} : vector<32x256xi32>
    %c8_i32 = arith.constant 8 : i32
    %c0_i32 = arith.constant 0 : i32
    %8 = arith.cmpi eq, %c8_i32, %c0_i32 : i32
    %c1_i32 = arith.constant 1 : i32
    %9 = arith.select %8, %c1_i32, %c8_i32 : i32
    %10 = vector.broadcast %9 : i32 to vector<32x256xi32>
    %11 = arith.remsi %7, %10 : vector<32x256xi32>
    %c0_i32_5 = arith.constant 0 : i32
    %12 = vector.broadcast %c0_i32_5 : i32 to vector<32x256xi32>
    %13 = arith.cmpi ne, %11, %12 : vector<32x256xi32>
    %c0_i32_6 = arith.constant 0 : i32
    %14 = vector.broadcast %c0_i32_6 : i32 to vector<32x256xi32>
    %15 = arith.cmpi slt, %11, %14 : vector<32x256xi32>
    %c0_i32_7 = arith.constant 0 : i32
    %16 = arith.cmpi slt, %9, %c0_i32_7 : i32
    %17 = vector.broadcast %16 : i1 to vector<32x256xi1>
    %18 = vector.broadcast %17 : vector<32x256xi1> to vector<32x256xi1>
    %19 = arith.xori %15, %18 : vector<32x256xi1>
    %20 = arith.andi %19, %13 : vector<32x256xi1>
    %21 = vector.broadcast %9 : i32 to vector<32x256xi32>
    %22 = arith.addi %11, %21 : vector<32x256xi32>
    %23 = arith.select %20, %22, %11 : vector<32x256xi1>, vector<32x256xi32>
    %cst_8 = arith.constant 0.000000e+00 : f32
    %24 = vector.broadcast %cst_8 : f32 to vector<32x256xf32>
    %c32_i32 = arith.constant 32 : i32
    %25 = vector.broadcast %c32_i32 : i32 to vector<32x256xi32>
    %26 = arith.cmpi sge, %6, %25 : vector<32x256xi32>
    %c224_i32 = arith.constant 224 : i32
    %27 = vector.broadcast %c224_i32 : i32 to vector<32x256xi32>
    %28 = arith.cmpi slt, %6, %27 : vector<32x256xi32>
    %c0_9 = arith.constant 0 : index
    %c0_10 = arith.constant 0 : index
    %29 = vector.load %arg4[%c0_9, %c0_10] : memref<9x256xf32, #tpu.memory_space<vmem>>, vector<9x256xf32>
    %30 = vector.extract_strided_slice %29 {offsets = [4, 0], sizes = [1, 256], strides = [1, 1]} : vector<9x256xf32> to vector<1x256xf32>
    %31 = vector.broadcast %30 : vector<1x256xf32> to vector<32x256xf32>
    %32 = arith.mulf %5, %31 : vector<32x256xf32>
    %c32_i32_11 = arith.constant 32 : i32
    %33 = tpu.dynamic_rotate %5 by %c32_i32_11 dim 1 : vector<32x256xf32>, i32 -> vector<32x256xf32>
    %34 = arith.select %26, %33, %24 : vector<32x256xi1>, vector<32x256xf32>
    %35 = vector.extract_strided_slice %29 {offsets = [3, 0], sizes = [1, 256], strides = [1, 1]} : vector<9x256xf32> to vector<1x256xf32>
    %36 = vector.broadcast %35 : vector<1x256xf32> to vector<32x256xf32>
    %37 = arith.mulf %34, %36 : vector<32x256xf32>
    %38 = arith.addf %32, %37 : vector<32x256xf32>
    %c224_i32_12 = arith.constant 224 : i32
    %39 = tpu.dynamic_rotate %5 by %c224_i32_12 dim 1 : vector<32x256xf32>, i32 -> vector<32x256xf32>
    %40 = arith.select %28, %39, %24 : vector<32x256xi1>, vector<32x256xf32>
    %41 = vector.extract_strided_slice %29 {offsets = [5, 0], sizes = [1, 256], strides = [1, 1]} : vector<9x256xf32> to vector<1x256xf32>
    %42 = vector.broadcast %41 : vector<1x256xf32> to vector<32x256xf32>
    %43 = arith.mulf %40, %42 : vector<32x256xf32>
    %44 = arith.addf %38, %43 : vector<32x256xf32>
    %c0_13 = arith.constant 0 : index
    %c0_14 = arith.constant 0 : index
    %45 = vector.load %arg5[%c0_13, %c0_14] : memref<1x256xf32, #tpu.memory_space<vmem>>, vector<1x256xf32>
    %46 = vector.broadcast %45 : vector<1x256xf32> to vector<32x256xf32>
    %47 = arith.addf %44, %46 : vector<32x256xf32>
    %48 = vector.extract_strided_slice %29 {offsets = [1, 0], sizes = [1, 256], strides = [1, 1]} : vector<9x256xf32> to vector<1x256xf32>
    %49 = vector.broadcast %48 : vector<1x256xf32> to vector<32x256xf32>
    %50 = arith.mulf %5, %49 : vector<32x256xf32>
    %c32_i32_15 = arith.constant 32 : i32
    %51 = tpu.dynamic_rotate %5 by %c32_i32_15 dim 1 : vector<32x256xf32>, i32 -> vector<32x256xf32>
    %52 = arith.select %26, %51, %24 : vector<32x256xi1>, vector<32x256xf32>
    %53 = vector.extract_strided_slice %29 {offsets = [0, 0], sizes = [1, 256], strides = [1, 1]} : vector<9x256xf32> to vector<1x256xf32>
    %54 = vector.broadcast %53 : vector<1x256xf32> to vector<32x256xf32>
    %55 = arith.mulf %52, %54 : vector<32x256xf32>
    %56 = arith.addf %50, %55 : vector<32x256xf32>
    %c224_i32_16 = arith.constant 224 : i32
    %57 = tpu.dynamic_rotate %5 by %c224_i32_16 dim 1 : vector<32x256xf32>, i32 -> vector<32x256xf32>
    %58 = arith.select %28, %57, %24 : vector<32x256xi1>, vector<32x256xf32>
    %59 = vector.extract_strided_slice %29 {offsets = [2, 0], sizes = [1, 256], strides = [1, 1]} : vector<9x256xf32> to vector<1x256xf32>
    %60 = vector.broadcast %59 : vector<1x256xf32> to vector<32x256xf32>
    %61 = arith.mulf %58, %60 : vector<32x256xf32>
    %62 = arith.addf %56, %61 : vector<32x256xf32>
    %c1_i32_17 = arith.constant 1 : i32
    %63 = tpu.dynamic_rotate %62 by %c1_i32_17 dim 0 : vector<32x256xf32>, i32 -> vector<32x256xf32>
    %c0_i32_18 = arith.constant 0 : i32
    %64 = vector.broadcast %c0_i32_18 : i32 to vector<32x256xi32>
    %65 = arith.cmpi sgt, %23, %64 : vector<32x256xi32>
    %66 = arith.select %65, %63, %24 : vector<32x256xi1>, vector<32x256xf32>
    %67 = arith.addf %47, %66 : vector<32x256xf32>
    %68 = vector.extract_strided_slice %29 {offsets = [7, 0], sizes = [1, 256], strides = [1, 1]} : vector<9x256xf32> to vector<1x256xf32>
    %69 = vector.broadcast %68 : vector<1x256xf32> to vector<32x256xf32>
    %70 = arith.mulf %5, %69 : vector<32x256xf32>
    %c32_i32_19 = arith.constant 32 : i32
    %71 = tpu.dynamic_rotate %5 by %c32_i32_19 dim 1 : vector<32x256xf32>, i32 -> vector<32x256xf32>
    %72 = arith.select %26, %71, %24 : vector<32x256xi1>, vector<32x256xf32>
    %73 = vector.extract_strided_slice %29 {offsets = [6, 0], sizes = [1, 256], strides = [1, 1]} : vector<9x256xf32> to vector<1x256xf32>
    %74 = vector.broadcast %73 : vector<1x256xf32> to vector<32x256xf32>
    %75 = arith.mulf %72, %74 : vector<32x256xf32>
    %76 = arith.addf %70, %75 : vector<32x256xf32>
    %c224_i32_20 = arith.constant 224 : i32
    %77 = tpu.dynamic_rotate %5 by %c224_i32_20 dim 1 : vector<32x256xf32>, i32 -> vector<32x256xf32>
    %78 = arith.select %28, %77, %24 : vector<32x256xi1>, vector<32x256xf32>
    %79 = vector.extract_strided_slice %29 {offsets = [8, 0], sizes = [1, 256], strides = [1, 1]} : vector<9x256xf32> to vector<1x256xf32>
    %80 = vector.broadcast %79 : vector<1x256xf32> to vector<32x256xf32>
    %81 = arith.mulf %78, %80 : vector<32x256xf32>
    %82 = arith.addf %76, %81 : vector<32x256xf32>
    %c31_i32 = arith.constant 31 : i32
    %83 = tpu.dynamic_rotate %82 by %c31_i32 dim 0 : vector<32x256xf32>, i32 -> vector<32x256xf32>
    %c7_i32 = arith.constant 7 : i32
    %84 = vector.broadcast %c7_i32 : i32 to vector<32x256xi32>
    %85 = arith.cmpi slt, %23, %84 : vector<32x256xi32>
    %86 = arith.select %85, %83, %24 : vector<32x256xi1>, vector<32x256xf32>
    %87 = arith.addf %67, %86 : vector<32x256xf32>
    %cst_21 = arith.constant 5.000000e-01 : f32
    %88 = vector.broadcast %cst_21 : f32 to vector<32x256xf32>
    %89 = arith.mulf %88, %87 : vector<32x256xf32>
    %cst_22 = arith.constant 0.707106769 : f32
    %90 = vector.broadcast %cst_22 : f32 to vector<32x256xf32>
    %91 = arith.mulf %87, %90 : vector<32x256xf32>
    %cst_23 = arith.constant 0.000000e+00 : f32
    %92 = vector.broadcast %cst_23 : f32 to vector<32x256xf32>
    %93 = arith.cmpf oge, %91, %92 : vector<32x256xf32>
    %cst_24 = arith.constant 1.000000e+00 : f32
    %cst_25 = arith.constant -1.000000e+00 : f32
    %94 = vector.broadcast %cst_24 : f32 to vector<32x256xf32>
    %95 = vector.broadcast %cst_25 : f32 to vector<32x256xf32>
    %96 = arith.select %93, %94, %95 : vector<32x256xi1>, vector<32x256xf32>
    %97 = math.absf %91 : vector<32x256xf32>
    %cst_26 = arith.constant 0.327591091 : f32
    %98 = vector.broadcast %cst_26 : f32 to vector<32x256xf32>
    %99 = arith.mulf %98, %97 : vector<32x256xf32>
    %cst_27 = arith.constant 1.000000e+00 : f32
    %100 = vector.broadcast %cst_27 : f32 to vector<32x256xf32>
    %101 = arith.addf %100, %99 : vector<32x256xf32>
    %102 = tpu.reciprocal %101 {approx = true} : vector<32x256xf32> -> vector<32x256xf32>
    %103 = arith.mulf %101, %102 : vector<32x256xf32>
    %cst_28 = arith.constant 2.000000e+00 : f32
    %104 = vector.broadcast %cst_28 : f32 to vector<32x256xf32>
    %105 = arith.subf %104, %103 : vector<32x256xf32>
    %106 = arith.mulf %102, %105 : vector<32x256xf32>
    %cst_29 = arith.constant 1.06140542 : f32
    %107 = vector.broadcast %cst_29 : f32 to vector<32x256xf32>
    %108 = arith.mulf %107, %106 : vector<32x256xf32>
    %cst_30 = arith.constant -1.45315206 : f32
    %109 = vector.broadcast %cst_30 : f32 to vector<32x256xf32>
    %110 = arith.addf %108, %109 : vector<32x256xf32>
    %111 = arith.mulf %110, %106 : vector<32x256xf32>
    %cst_31 = arith.constant 1.42141378 : f32
    %112 = vector.broadcast %cst_31 : f32 to vector<32x256xf32>
    %113 = arith.addf %111, %112 : vector<32x256xf32>
    %114 = arith.mulf %113, %106 : vector<32x256xf32>
    %cst_32 = arith.constant -0.284496725 : f32
    %115 = vector.broadcast %cst_32 : f32 to vector<32x256xf32>
    %116 = arith.addf %114, %115 : vector<32x256xf32>
    %117 = arith.mulf %116, %106 : vector<32x256xf32>
    %cst_33 = arith.constant 0.254829586 : f32
    %118 = vector.broadcast %cst_33 : f32 to vector<32x256xf32>
    %119 = arith.addf %117, %118 : vector<32x256xf32>
    %120 = arith.mulf %119, %106 : vector<32x256xf32>
    %cst_34 = arith.constant 0.000000e+00 : f32
    %121 = vector.broadcast %cst_34 : f32 to vector<32x256xf32>
    %122 = arith.subf %121, %97 : vector<32x256xf32>
    %123 = arith.mulf %122, %97 : vector<32x256xf32>
    %124 = math.exp %123 : vector<32x256xf32>
    %125 = arith.mulf %120, %124 : vector<32x256xf32>
    %cst_35 = arith.constant 1.000000e+00 : f32
    %126 = vector.broadcast %cst_35 : f32 to vector<32x256xf32>
    %127 = arith.subf %126, %125 : vector<32x256xf32>
    %128 = arith.mulf %96, %127 : vector<32x256xf32>
    %cst_36 = arith.constant 1.000000e+00 : f32
    %129 = vector.broadcast %cst_36 : f32 to vector<32x256xf32>
    %130 = arith.addf %129, %128 : vector<32x256xf32>
    %131 = arith.mulf %89, %130 : vector<32x256xf32>
    %c0_37 = arith.constant 0 : index
    %c0_38 = arith.constant 0 : index
    %132 = vector.load %arg6[%c0_37, %c0_38] : memref<256x128xf32, #tpu.memory_space<vmem>>, vector<256x128xf32>
    %cst_39 = arith.constant dense<0.000000e+00> : vector<32x128xf32>
    %133 = tpu.matmul %131, %132, %cst_39 {dimension_numbers = #tpu.dot_dimension_numbers<[1], [0], [0], [1], [0, 0, 1, 1], [], []>} : vector<32x256xf32>, vector<256x128xf32>, vector<32x128xf32> -> vector<32x128xf32>
    %c0_40 = arith.constant 0 : index
    %c0_41 = arith.constant 0 : index
    %134 = vector.load %arg7[%c0_40, %c0_41] : memref<1x128xf32, #tpu.memory_space<vmem>>, vector<1x128xf32>
    %135 = vector.broadcast %134 : vector<1x128xf32> to vector<32x128xf32>
    %136 = arith.addf %133, %135 : vector<32x128xf32>
    %c0_42 = arith.constant 0 : index
    %c0_43 = arith.constant 0 : index
    %137 = vector.load %arg8[%c0_42, %c0_43] : memref<32x128xf32, #tpu.memory_space<vmem>>, vector<32x128xf32>
    tpu.vector_store %arg8[%c0_42, %c0_43], %136 {strides = array<i32>} : memref<32x128xf32, #tpu.memory_space<vmem>>, vector<32x128xf32>,
    return
  }
  func.func @transform_0(%arg0: i32) -> (i32, i32) {
    %c0_i32 = arith.constant 0 : i32
    %c0_i32_0 = arith.constant 0 : i32
    return %arg0, %c0_i32 : i32, i32
  }
  func.func @transform_1(%arg0: i32) -> (i32, i32) {
    %c0_i32 = arith.constant 0 : i32
    %c0_i32_0 = arith.constant 0 : i32
    %c0_i32_1 = arith.constant 0 : i32
    return %c0_i32, %c0_i32_0 : i32, i32
  }
  func.func @transform_2(%arg0: i32) -> (i32, i32) {
    %c0_i32 = arith.constant 0 : i32
    %c0_i32_0 = arith.constant 0 : i32
    %c0_i32_1 = arith.constant 0 : i32
    return %c0_i32, %c0_i32_0 : i32, i32
  }
  func.func @transform_3(%arg0: i32) -> (i32, i32) {
    %c0_i32 = arith.constant 0 : i32
    %c0_i32_0 = arith.constant 0 : i32
    %c0_i32_1 = arith.constant 0 : i32
    return %c0_i32, %c0_i32_0 : i32, i32
  }
  func.func @transform_4(%arg0: i32) -> (i32, i32) {
    %c0_i32 = arith.constant 0 : i32
    %c0_i32_0 = arith.constant 0 : i32
    %c0_i32_1 = arith.constant 0 : i32
    return %c0_i32, %c0_i32_0 : i32, i32
  }
  func.func @transform_5(%arg0: i32) -> (i32, i32) {
    %c0_i32 = arith.constant 0 : i32
    %c0_i32_0 = arith.constant 0 : i32
    %c0_i32_1 = arith.constant 0 : i32
    return %c0_i32, %c0_i32_0 : i32, i32
  }
  func.func @transform_6(%arg0: i32) -> (i32, i32) {
    %c0_i32 = arith.constant 0 : i32
    %c0_i32_0 = arith.constant 0 : i32
    %c0_i32_1 = arith.constant 0 : i32
    return %c0_i32, %c0_i32_0 : i32, i32
  }
  func.func @transform_7(%arg0: i32) -> (i32, i32) {
    %c0_i32 = arith.constant 0 : i32
    %c0_i32_0 = arith.constant 0 : i32
    return %arg0, %c0_i32 : i32, i32
  }
}

</mosaic_0001>

<bundles_post_ra>
// kernel: tpu_custom_call.1
= control target key start
LH: loop header
LB: loop body
LE: loop exit
PB: predicated region body
PF: predicated region fallthrough
CT: control target
= control target key end

     0   :  { %12 = vsyncpa [#allocation3], 0  ;;  %s1891_s0 = inlined_call_operand.hbm [shape: f32[32,128], index: 0, kind: input, shape index: {}]   ;;  %s1892_s1 = inlined_call_operand.hbm [shape: f32[128,256], index: 1, kind: input, shape index: {}]   ;;  %s1893_s2 = inlined_call_operand.hbm [shape: f32[1,256], index: 2, kind: input, shape index: {}]   ;;  %s1894_s3 = inlined_call_operand.hbm [shape: f32[9,256], index: 3, kind: input, shape index: {}]   ;;  %s1895_s4 = inlined_call_operand.vmem [shape: f32[1,256], index: 4, kind: input, shape index: {}]   ;;  %s1896_s5 = inlined_call_operand.hbm [shape: f32[256,128], index: 5, kind: input, shape index: {}]   ;;  %s1897_s6 = inlined_call_operand.vmem [shape: f32[1,128], index: 6, kind: input, shape index: {}]   ;;  %s1898_s7 = inlined_call_operand.hbm [shape: f32[32,128], index: 7, kind: output, shape index: {}]  }
   0x1   :  { %13 = vsyncpa [#allocation6], 0 }
   0x2   :  { %14 = vsyncpa [#allocation9], 0  ;;  %s33_s26 = sshll.u32 %s1892_s1, 4  ;;  %s34_s26 = int_to_ptr.hbm [resolvable:$true] %s33_s26 }
   0x3   :  { %15 = vsyncpa [#allocation4], 0  ;;  %s1110_s27 = smov [#allocation5]   ;;  %s57_s8 = sshll.u32 %s1894_s3, 4  ;;  %s58_s8 = int_to_ptr.hbm [resolvable:$true] %s57_s8 }
   0x4   :  { %s35_s28 = sshll.u32 %s1110_s27, 4  ;;  %s1111_s9 = smov 256   ;;  %s36_s28 = int_to_ptr.vmem [resolvable:$true] %s35_s28 }
   0x5   :  { %s1112_s10 = smov 16   ;;  %s1113_s11 = smov [#allocation8]  }
   0x6   :  { %41 = dma.hbm_to_vmem [thread:$0]  %s34_s26, 4096, %s36_s28, [#allocation6], %s1111_s9, %s1111_s9, %s1112_s10  }
   0x7   :  { %s59_s12 = sshll.u32 %s1113_s11, 4  ;;  %s20_s15 = sshll.u32 %s1891_s0, 4  ;;  %s60_s12 = int_to_ptr.vmem [resolvable:$true] %s59_s12  ;;  %s21_s15 = int_to_ptr.hbm [resolvable:$true] %s20_s15 }
   0x8   :  { %65 = dma.hbm_to_vmem [thread:$0]  %s58_s8, 512, %s60_s12, [#allocation9], %s1111_s9, %s1111_s9, %s1112_s10  }
   0x9   :  { %s1114_s1 = smov [#allocation2]   ;;  %s47_s3 = sshll.u32 %s1893_s2, 4  ;;  %s48_s3 = int_to_ptr.hbm [resolvable:$true] %s47_s3 }
   0xa   :  { %s22_s16 = sshll.u32 %s1114_s1, 4  ;;  %s1115_s19 = smov 128   ;;  %s23_s16 = int_to_ptr.vmem [resolvable:$true] %s22_s16 }
   0xb   :  { %s1116_s20 = smov 8   ;;  %s1117_s21 = smov [#allocation7]  }
   0xc   :  { %28 = dma.hbm_to_vmem [thread:$0]  %s21_s15, 512, %s23_s16, [#allocation3], %s1115_s19, %s1115_s19, %s1116_s20  }
   0xd   :  { %s49_s22 = sshll.u32 %s1117_s21, 4  ;;  %s72_s24 = sshll.u32 %s1896_s5, 4  ;;  %s50_s22 = int_to_ptr.vmem [resolvable:$true] %s49_s22  ;;  %s73_s24 = int_to_ptr.hbm [resolvable:$true] %s72_s24 }
   0xe   :  { %52 = dma.hbm_to_vmem [thread:$0]  %s48_s3, 32, %s50_s22, [#allocation6]  }
   0xf   :  { %s1118_s25 = smov [#allocation10]  }
  0x10   :  { %s74_s26 = sshll.u32 %s1118_s25, 4  ;;  %s75_s26 = int_to_ptr.vmem [resolvable:$true] %s74_s26 }
  0x11   :  { %80 = dma.hbm_to_vmem [thread:$0]  %s73_s24, 4096, %s75_s26, [#allocation9], %s1115_s19, %s1115_s19, %s1116_s20  }
  0x12   :  { %1102 = dma.done.wait [#allocation3], 512  }
  0x13   :  { %1103 = vsyncadd [#allocation3], 4294966784 }
  0x14   :  { %1104 = dma.done.wait [#allocation6], 4128  }
  0x15   :  { %1105 = vsyncadd [#allocation6], 4294963168 }
  0x16   :  { %1106 = dma.done.wait [#allocation9], 4608  }
  0x17   :  { %1107 = vsyncadd [#allocation9], 4294962688  ;;  %v137_v0 = vld [vmem:[#allocation5 + $0xf0] sm:$0xff]  ;;  %v138_v1 = vld [vmem:[#allocation5 + $0xf8] sm:$0xff]  ;;  %s1119_s2 = smov 96   ;;  %s1120_s5 = smov 32   ;;  %v203_v57 = vlaneseq }
  0x18   :  { %v135_v2 = vld [vmem:[#allocation5 + $0xe0] sm:$0xff]  ;;  %145 = vmatpush.msra.mxu0 %v137_v0  ;;  %174 = vmatpush.msra.mxu1 %v138_v1  ;;  %v136_v3 = vld [vmem:[#allocation5 + $0xe8] sm:$0xff]  ;;  %v133_v4 = vld [vmem:[#allocation5 + $0xd0] sm:$0xff]  ;;  %s1122_s30 = smov [#allocation11]   ;;  %s895_s10 = sshll.u32 %s1898_s7, 4  ;;  %s896_s10 = int_to_ptr.hbm [resolvable:$true] %s895_s10 }
  0x19   :  { %v134_v5 = vld [vmem:[#allocation5 + $0xd8] sm:$0xff]  ;;  %v131_v6 = vld [vmem:[#allocation5 + $0xc0] sm:$0xff]  ;;  %v132_v7 = vld [vmem:[#allocation5 + $0xc8] sm:$0xff]  ;;  %v1210_v58 = vand.u32 127, %v203_v57  ;;  %s893_s8 = sshll.u32 %s1122_s30, 4  ;;  %s894_s8 = int_to_ptr.vmem [resolvable:$true] %s893_s8 }
  0x1a   :  { %146 = vmatpush.msra.mxu0 %v135_v2  ;;  %175 = vmatpush.msra.mxu1 %v136_v3  ;;  %v129_v8 = vld [vmem:[#allocation5 + $0xb0] sm:$0xff]  ;;  %v130_v9 = vld [vmem:[#allocation5 + $0xb8] sm:$0xff]  ;;  %v127_v10 = vld [vmem:[#allocation5 + $0xa0] sm:$0xff] }
  0x1b   :  { %v128_v11 = vld [vmem:[#allocation5 + $0xa8] sm:$0xff]  ;;  %v125_v12 = vld [vmem:[#allocation5 + $0x90] sm:$0xff]  ;;  %v126_v13 = vld [vmem:[#allocation5 + $0x98] sm:$0xff]  ;;  %vm293_vm0 = vcmp.lt.s32.totalorder %v1210_v58, 32  ;;  %vm259_vm1 = vcmp.ge.s32.totalorder %v1210_v58, 32  ;;  %vm344_vm2 = vcmp.lt.s32.totalorder %v1210_v58, 96 }
  0x1c   :  { %147 = vmatpush.msra.mxu0 %v133_v4  ;;  %176 = vmatpush.msra.mxu1 %v134_v5  ;;  %v123_v14 = vld [vmem:[#allocation5 + $0x80] sm:$0xff]  ;;  %v124_v15 = vld [vmem:[#allocation5 + $0x88] sm:$0xff]  ;;  %v121_v16 = vld [vmem:[#allocation5 + $0x70] sm:$0xff] }
  0x1d   :  { %v122_v17 = vld [vmem:[#allocation5 + $0x78] sm:$0xff]  ;;  %v119_v18 = vld [vmem:[#allocation5 + $0x60] sm:$0xff]  ;;  %v120_v19 = vld [vmem:[#allocation5 + $0x68] sm:$0xff] }
  0x1e   :  { %148 = vmatpush.msra.mxu0 %v131_v6  ;;  %177 = vmatpush.msra.mxu1 %v132_v7  ;;  %v117_v20 = vld [vmem:[#allocation5 + $0x50] sm:$0xff]  ;;  %v118_v21 = vld [vmem:[#allocation5 + $0x58] sm:$0xff]  ;;  %v115_v22 = vld [vmem:[#allocation5 + $0x40] sm:$0xff]  ;;  %v1232_v6 = vshrl.u32 %v203_v57, 7 }
  0x1f   :  { %v116_v23 = vld [vmem:[#allocation5 + $0x48] sm:$0xff]  ;;  %v113_v24 = vld [vmem:[#allocation5 + $0x30] sm:$0xff]  ;;  %v114_v25 = vld [vmem:[#allocation5 + $0x38] sm:$0xff] }
  0x20   :  { %149 = vmatpush.msra.mxu0 %v129_v8  ;;  %178 = vmatpush.msra.mxu1 %v130_v9  ;;  %v111_v26 = vld [vmem:[#allocation5 + $0x20] sm:$0xff]  ;;  %v112_v27 = vld [vmem:[#allocation5 + $0x28] sm:$0xff]  ;;  %v109_v28 = vld [vmem:[#allocation5 + $0x10] sm:$0xff]  ;;  %vm447_vm4 = vcmp.lt.s32.totalorder %v1232_v6, 1  ;;  %vm530_vm5 = vcmp.lt.s32.totalorder %v1232_v6, 7 }
  0x21   :  { %v110_v29 = vld [vmem:[#allocation5 + $0x18] sm:$0xff]  ;;  %v107_v30 = vld [vmem:[#allocation5] sm:$0xff]  ;;  %v108_v31 = vld [vmem:[#allocation5 + $0x8] sm:$0xff] }
  0x22   :  { %150 = vmatpush.msra.mxu0 %v127_v10  ;;  %179 = vmatpush.msra.mxu1 %v128_v11  ;;  %v103_v32 = vld [vmem:[#allocation2] sm:$0xff]  ;;  %v104_v33 = vld [vmem:[#allocation2 + $0x8] sm:$0xff]  ;;  %v105_v34 = vld [vmem:[#allocation2 + $0x10] sm:$0xff] }
  0x23   :  { %v106_v35 = vld [vmem:[#allocation2 + $0x18] sm:$0xff]  ;;  %v139_v36 = vld [vmem:[#allocation7] sm:$0x3]  ;;  %v264_v59 = vld [vmem:[#allocation8 + $0x8] sm:$0xff] }
  0x24   :  { %151 = vmatpush.msra.mxu0 %v125_v12  ;;  %180 = vmatpush.msra.mxu1 %v126_v13  ;;  %v141_v37 = vperm.slane %v139_v36, 0  ;;  %v142_v38 = vperm.slane %v139_v36, 1  ;;  %v263_v60 = vld [vmem:[#allocation8] sm:$0xff]  ;;  %v1212_v61 = vperm.slane %v264_v59, 1  ;;  %v1219_v0 = vperm.slane %v264_v59, 7 }
  0x25   :  { %v1215_v62 = vperm.slane %v263_v60, 1  ;;  %v1217_v63 = vperm.slane %v263_v60, 7  ;;  %v1221_v2 = vperm.slane %v263_v60, 4  ;;  %v1224_v3 = vperm.slane %v264_v59, 4 }
  0x26   :  { %152 = vmatpush.msra.mxu0 %v123_v14  ;;  %181 = vmatpush.msra.mxu1 %v124_v15  ;;  %v1250_v12 = vperm.slane %v263_v60, 0  ;;  %v1252_v13 = vperm.slane %v264_v59, 0 }
  0x28   :  { %153 = vmatpush.msra.mxu0 %v121_v16  ;;  %182 = vmatpush.msra.mxu1 %v122_v17  ;;  %v1255_v16 = vperm.slane %v263_v60, 6 }
  0x2a   :  { %154 = vmatpush.msra.mxu0 %v119_v18  ;;  %183 = vmatpush.msra.mxu1 %v120_v19 }
  0x2c   :  { %155 = vmatpush.msra.mxu0 %v117_v20  ;;  %184 = vmatpush.msra.mxu1 %v118_v21  ;;  %v1261_v20 = vperm.slane %v263_v60, 3 }
  0x2e   :  { %156 = vmatpush.msra.mxu0 %v115_v22  ;;  %185 = vmatpush.msra.mxu1 %v116_v23 }
  0x30   :  { %157 = vmatpush.msra.mxu0 %v113_v24  ;;  %186 = vmatpush.msra.mxu1 %v114_v25  ;;  %v379_v24 = vld [vmem:[%s1895_s4] sm:$0x3]  ;;  %v1269_v25 = vperm.slane %v264_v59, 3 }
  0x32   :  { %158 = vmatpush.msra.mxu0 %v111_v26  ;;  %187 = vmatpush.msra.mxu1 %v112_v27  ;;  %v1271_v26 = vperm.slane %v264_v59, 6  ;;  %v1274_v27 = vadd.s32 128, %v1210_v58 }
  0x34   :  { %159 = vmatpush.msra.mxu0 %v109_v28  ;;  %188 = vmatpush.msra.mxu1 %v110_v29  ;;  %v1277_v28 = vadd.s32 8, %v1232_v6  ;;  %vm262_vm3 = vcmp.lt.s32.totalorder %v1274_v27, 224 }
  0x36   :  { %160 = vmatpush.msra.mxu0 %v107_v30  ;;  %189 = vmatpush.msra.mxu1 %v108_v31  ;;  %v1282_v31 = vperm.slane %v263_v60, 5 }
  0x37   :  { %161 = vmatmul.f32.vlgmr.msra.gmra.mxu0 %v103_v32  ;;  %190 = vmatmul.f32.vlgmr.msra.gmra.mxu1 %v103_v32 }
  0x3f   :  { %164 = vmatmul.f32.gmra.mxu0 %v104_v33  ;;  %193 = vmatmul.f32.gmra.mxu1 %v104_v33 }
  0x47   :  { %167 = vmatmul.f32.gmra.mxu0 %v105_v34  ;;  %196 = vmatmul.f32.gmra.mxu1 %v105_v34  ;;  %v1287_v34 = vperm.slane %v264_v59, 5 }
  0x4f   :  { %170 = vmatmul.f32.gmra.mxu0 %v106_v35  ;;  %199 = vmatmul.f32.gmra.mxu1 %v106_v35  ;;  %v1289_v35 = vperm.slane %v379_v24, 0 }
  0xb4   :  { %v162_v39 = vpop.f32.mrf.mxu0  ;;  %v191_v40 = vpop.f32.mrf.mxu1 }
  0xb5   :  { %v1184_v41 = vadd.f32 %v162_v39, %v141_v37  ;;  %v1186_v42 = vadd.f32 %v191_v40, %v142_v38  ;;  %v1299_v39 = vperm.slane %v264_v59, 2  ;;  %v1301_v40 = vld [vmem:[#allocation8 + $0x10] ss:$0 sm:$0xff] }
  0xb7   :  { %336 = vrot.lane.b32.xlu2 %v1186_v42, %s1119_s2  ;;  %285 = vrot.lane.b32.xlu1 %v1186_v42, %s1120_s5  ;;  %v1230_v5 = vmul.f32 %v1212_v61, %v1186_v42  ;;  %v1236_v7 = vmul.f32 %v1219_v0, %v1186_v42  ;;  %v1240_v8 = vmul.f32 %v1215_v62, %v1184_v41 }
  0xb8   :  { %277 = vrot.lane.b32.xlu0 %v1184_v41, %s1120_s5  ;;  %v1244_v9 = vmul.f32 %v1217_v63, %v1184_v41  ;;  %1918 = vst [vmem:[#allocation17_spill] sm:$0xff] %v1299_v39 }
  0xbc   :  { %v165_v43 = vpop.f32.mrf.mxu0  ;;  %v194_v44 = vpop.f32.mrf.mxu1 }
  0xbd   :  { %v166_v45 = vadd.f32 %v165_v43, %v141_v37  ;;  %v195_v48 = vadd.f32 %v194_v44, %v142_v38 }
  0xbf   :  { %330 = vrot.lane.b32.xlu1 %v166_v45, %s1119_s2  ;;  %279 = vrot.lane.b32.xlu2 %v166_v45, %s1120_s5  ;;  %v1247_v10 = vmul.f32 %v1224_v3, %v195_v48  ;;  %v398_v11 = vmul.f32 %v1212_v61, %v195_v48  ;;  %v481_v15 = vmul.f32 %v1219_v0, %v195_v48 }
  0xc0   :  { %328 = vrot.lane.b32.xlu0 %v1184_v41, %s1119_s2  ;;  %v271_v21 = vmul.f32 %v1221_v2, %v166_v45  ;;  %v397_v22 = vmul.f32 %v1215_v62, %v166_v45  ;;  %v480_v23 = vmul.f32 %v1217_v63, %v166_v45  ;;  %v1306_v45 = vld [vmem:[#allocation8 + $0x18] ss:$0 sm:$0xff] }
  0xc4   :  { %v168_v46 = vpop.f32.mrf.mxu0  ;;  %v197_v47 = vpop.f32.mrf.mxu1 }
  0xc5   :  { %v1198_v53 = vadd.f32 %v168_v46, %v141_v37  ;;  %v1203_v54 = vadd.f32 %v197_v47, %v142_v38 }
  0xc7   :  { %287 = vrot.lane.b32.xlu2 %v195_v48, %s1120_s5  ;;  %1917 = vst [vmem:[#allocation16_spill] sm:$0xff] %v1203_v54 }
  0xcc   :  { %v171_v49 = vpop.f32.mrf.mxu0  ;;  %v200_v50 = vpop.f32.mrf.mxu1 }
  0xcd   :  { %v1192_v51 = vadd.f32 %v171_v49, %v141_v37  ;;  %v1194_v52 = vadd.f32 %v200_v50, %v142_v38  ;;  %v1295_v37 = vperm.slane %v379_v24, 1  ;;  %v1297_v38 = vperm.slane %v263_v60, 2 }
  0xcf   :  { %291 = vrot.lane.b32.xlu1 %v1194_v52, %s1120_s5  ;;  %338 = vrot.lane.b32.xlu2 %v195_v48, %s1119_s2 }
  0xd0   :  { %283 = vrot.lane.b32.xlu0 %v1192_v51, %s1120_s5 }
  0xd7   :  { %334 = vrot.lane.b32.xlu1 %v1192_v51, %s1119_s2  ;;  %332 = vrot.lane.b32.xlu2 %v1198_v53, %s1119_s2 }
  0xd8   :  { %342 = vrot.lane.b32.xlu0 %v1194_v52, %s1119_s2 }
  0xdf   :  { %289 = vrot.lane.b32.xlu1 %v1203_v54, %s1120_s5 }
  0xe0   :  { %281 = vrot.lane.b32.xlu0 %v1198_v53, %s1120_s5 }
  0xe8   :  { %340 = vrot.lane.b32.xlu0 %v1203_v54, %s1119_s2 }
 0x111   :  { %v1208_v55 = vpop.permute.xlu2 %336 }
 0x119   :  { %v280_v56 = vpop.permute.xlu2 %279 }
 0x121   :  { %v288_v1 = vpop.permute.xlu2 %287 }
 0x122   :  { %v299_v4 = vsel %vm293_vm0, %v288_v1, %v280_v56  ;;  %v295_v17 = vsel %vm293_vm0, %v280_v56, %v288_v1 }
 0x123   :  { %v304_v18 = vsel %vm259_vm1, %v299_v4, 0.0  ;;  %v408_v30 = vmul.f32 %v1252_v13, %v295_v17  ;;  %v315_v43 = vmul.f32 %v1269_v25, %v295_v17  ;;  %v491_v44 = vmul.f32 %v1271_v26, %v295_v17 }
 0x124   :  { %v407_v29 = vmul.f32 %v1250_v12, %v304_v18  ;;  %v490_v32 = vmul.f32 %v1255_v16, %v304_v18  ;;  %v314_v47 = vmul.f32 %v1261_v20, %v304_v18 }
 0x125   :  { %v416_v49 = vadd.f32 %v408_v30, %v398_v11  ;;  %v499_v30 = vadd.f32 %v491_v44, %v481_v15 }
 0x126   :  { %v415_v48 = vadd.f32 %v407_v29, %v397_v22  ;;  %v498_v59 = vadd.f32 %v490_v32, %v480_v23  ;;  %v322_v44 = vadd.f32 %v314_v47, %v271_v21 }
 0x129   :  { %v286_v14 = vpop.permute.xlu1 %285  ;;  %v339_v50 = vpop.permute.xlu2 %338 }
 0x12a   :  { %v278_v19 = vpop.permute.xlu0 %277 }
 0x12b   :  { %v298_v33 = vsel %vm293_vm0, %v286_v14, %v278_v19  ;;  %v1293_v36 = vsel %vm293_vm0, %v278_v19, %v286_v14 }
 0x12c   :  { %v1312_v56 = vsel %vm259_vm1, %v298_v33, 0.0  ;;  %v406_v60 = vmul.f32 %v1252_v13, %v1293_v36  ;;  %v489_v11 = vmul.f32 %v1271_v26, %v1293_v36 }
 0x12d   :  { %v405_v22 = vmul.f32 %v1250_v12, %v1312_v56  ;;  %v488_v23 = vmul.f32 %v1255_v16, %v1312_v56 }
 0x131   :  { %v331_v57 = vpop.permute.xlu1 %330 }
 0x132   :  { %v346_v1 = vsel %vm344_vm2, %v331_v57, %v339_v50  ;;  %v350_v4 = vsel %vm344_vm2, %v339_v50, %v331_v57  ;;  %v329_v14 = vpop.permute.xlu0 %328 }
 0x133   :  { %v356_v17 = vsel %vm262_vm3, %v350_v4, 0.0  ;;  %v425_v18 = vmul.f32 %v1297_v38, %v346_v1  ;;  %v508_v19 = vmul.f32 %v1301_v40, %v346_v1  ;;  %v365_v32 = vmul.f32 %v1282_v31, %v346_v1 }
 0x134   :  { %v426_v24 = vmul.f32 %v1299_v39, %v356_v17  ;;  %v509_v29 = vmul.f32 %v1306_v45, %v356_v17  ;;  %v366_v33 = vmul.f32 %v1287_v34, %v356_v17  ;;  %v349_v50 = vsel %vm344_vm2, %v1208_v55, %v329_v14 }
 0x135   :  { %v1337_v57 = vadd.f32 %v425_v18, %v415_v48  ;;  %v1339_v4 = vadd.f32 %v508_v19, %v498_v59  ;;  %v1344_v46 = vsel %vm344_vm2, %v329_v14, %v1208_v55  ;;  %v1348_v15 = vsel %vm262_vm3, %v349_v50, 0.0 }
 0x136   :  { %v323_v1 = vadd.f32 %v315_v43, %v1247_v10  ;;  %v414_v17 = vadd.f32 %v406_v60, %v1230_v5  ;;  %v1352_v54 = vadd.f32 %v426_v24, %v416_v49  ;;  %v413_v48 = vadd.f32 %v405_v22, %v1240_v8 }
 0x137   :  { %1919 = vst [vmem:[#allocation18_spill] sm:$0xff] %v1337_v57  ;;  %v496_v59 = vadd.f32 %v488_v23, %v1244_v9  ;;  %v497_v18 = vadd.f32 %v489_v11, %v1236_v7  ;;  %v1357_v19 = vadd.f32 %v509_v29, %v499_v30  ;;  %v373_v55 = vadd.f32 %v365_v32, %v322_v44 }
 0x138   :  { %1920 = vst [vmem:[#allocation19_spill] sm:$0xff] %v1339_v4  ;;  %v423_v14 = vmul.f32 %v1297_v38, %v1344_v46  ;;  %v424_v21 = vmul.f32 %v1299_v39, %v1348_v15  ;;  %v506_v5 = vmul.f32 %v1301_v40, %v1344_v46  ;;  %v374_v10 = vadd.f32 %v366_v33, %v323_v1 }
 0x139   :  { %1921 = vst [vmem:[#allocation20_spill] sm:$0xff] %v1352_v54  ;;  %v1902_v43 = vrot.slane %v1337_v57, 7  ;;  %v1903_v8 = vrot.slane %v1339_v4, 1  ;;  %v507_v7 = vmul.f32 %v1306_v45, %v1348_v15  ;;  %v1901_v9 = vrot.slane %v1352_v54, 7  ;;  %v800_v57 = vld [vmem:[#allocation10 + $0x48] sm:$0xff]  ;;  %v798_v4 = vld [vmem:[#allocation10 + $0x38] sm:$0xff] }
 0x13a   :  { %1922 = vst [vmem:[#allocation21_spill] sm:$0xff] %v1357_v19  ;;  %v1370_v47 = vadd.f32 %v423_v14, %v413_v48  ;;  %v1372_v49 = vadd.f32 %v424_v21, %v414_v17  ;;  %v1374_v60 = vadd.f32 %v506_v5, %v496_v59  ;;  %v1904_v11 = vrot.slane %v1357_v19, 1  ;;  %v806_v14 = vld [vmem:[#allocation10 + $0x78] sm:$0xff]  ;;  %v805_v5 = vld [vmem:[#allocation10 + $0x70] sm:$0xff] }
 0x13b   :  { %v1377_v22 = vadd.f32 %v507_v7, %v497_v18  ;;  %v1923_v30 = vand.u32 7, %v1277_v28  ;;  %v387_v32 = vadd.f32 %v1289_v35, %v373_v55  ;;  %v388_v50 = vadd.f32 %v1295_v37, %v374_v10  ;;  %v822_v21 = vld [vmem:[#allocation10 + $0xf8] sm:$0xff]  ;;  %827 = vmatpush.msra.mxu2 %v806_v14 }
 0x13c   :  { %v1908_v23 = vrot.slane %v1370_v47, 7  ;;  %v1906_v24 = vrot.slane %v1372_v49, 7  ;;  %v1907_v29 = vrot.slane %v1374_v60, 1  ;;  %856 = vmatpush.msra.mxu3 %v822_v21  ;;  %v802_v14 = vld [vmem:[#allocation10 + $0x58] sm:$0xff] }
 0x13d   :  { %vm457_vm6 = vcmp.gt.s32.totalorder %v1923_v30, 0  ;;  %v1905_v33 = vrot.slane %v1377_v22, 1  ;;  %828 = vmatpush.msra.mxu2 %v805_v5  ;;  %v818_v21 = vld [vmem:[#allocation10 + $0xd8] sm:$0xff] }
 0x13e   :  { %v1395_v44 = vsel %vm530_vm5, %v1907_v29, %v1903_v8  ;;  %v452_v1 = vsel %vm447_vm4, %v1908_v23, %v1902_v43  ;;  %v453_v17 = vsel %vm447_vm4, %v1906_v24, %v1901_v9  ;;  %v821_v9 = vld [vmem:[#allocation10 + $0xf0] sm:$0xff]  ;;  %v804_v8 = vld [vmem:[#allocation10 + $0x68] sm:$0xff]  ;;  %v313_v24 = vmul.f32 %v1269_v25, %v1293_v36 }
 0x13f   :  { %v1415_v48 = vsel %vm530_vm5, %v1905_v33, %v1904_v11  ;;  %v462_v59 = vsel %vm457_vm6, %v452_v1, 0.0  ;;  %v463_v18 = vsel %vm457_vm6, %v453_v17, 0.0  ;;  %v820_v11 = vld [vmem:[#allocation10 + $0xe8] sm:$0xff]  ;;  %857 = vmatpush.msra.mxu3 %v821_v9  ;;  %v803_v17 = vld [vmem:[#allocation10 + $0x60] sm:$0xff]  ;;  %829 = vmatpush.msra.mxu2 %v804_v8  ;;  %v269_v9 = vmul.f32 %v1221_v2, %v1184_v41  ;;  %v817_v33 = vld [vmem:[#allocation10 + $0xd0] sm:$0xff] }
 0x140   :  { %v1417_v10 = vadd.f32 %v462_v59, %v387_v32  ;;  %v1419_v7 = vadd.f32 %v463_v18, %v388_v50  ;;  %v819_v32 = vld [vmem:[#allocation10 + $0xe0] sm:$0xff]  ;;  %v312_v50 = vmul.f32 %v1261_v20, %v1312_v56  ;;  %v270_v18 = vmul.f32 %v1224_v3, %v1186_v42  ;;  %v816_v36 = vld [vmem:[#allocation10 + $0xc8] sm:$0xff] }
 0x141   :  { %v292_v55 = vpop.permute.xlu1 %291  ;;  %858 = vmatpush.msra.mxu3 %v820_v11  ;;  %v401_v56 = vmul.f32 %v1215_v62, %v1192_v51  ;;  %830 = vmatpush.msra.mxu2 %v803_v17  ;;  %v402_v8 = vmul.f32 %v1212_v61, %v1194_v52  ;;  %v484_v42 = vmul.f32 %v1217_v63, %v1192_v51 }
 0x142   :  { %1924 = vst [vmem:[#allocation22_spill] sm:$0xff] %v1417_v10  ;;  %v284_v30 = vpop.permute.xlu0 %283  ;;  %v485_v11 = vmul.f32 %v1219_v0, %v1194_v52  ;;  %v320_v17 = vadd.f32 %v312_v50, %v269_v9  ;;  %v363_v23 = vmul.f32 %v1282_v31, %v1344_v46 }
 0x143   :  { %1925 = vst [vmem:[#allocation23_spill] sm:$0xff] %v1419_v7  ;;  %v301_v43 = vsel %vm293_vm0, %v292_v55, %v284_v30  ;;  %v1431_v59 = vsel %vm293_vm0, %v284_v30, %v292_v55  ;;  %859 = vmatpush.msra.mxu3 %v819_v32  ;;  %v801_v30 = vld [vmem:[#allocation10 + $0x50] sm:$0xff]  ;;  %831 = vmatpush.msra.mxu2 %v802_v14 }
 0x144   :  { %v1425_v1 = vsel %vm259_vm1, %v301_v43, 0.0  ;;  %v412_v41 = vmul.f32 %v1252_v13, %v1431_v59  ;;  %v495_v32 = vmul.f32 %v1271_v26, %v1431_v59 }
 0x145   :  { %v411_v43 = vmul.f32 %v1250_v12, %v1425_v1  ;;  %v494_v55 = vmul.f32 %v1255_v16, %v1425_v1  ;;  %860 = vmatpush.msra.mxu3 %v818_v21  ;;  %832 = vmatpush.msra.mxu2 %v801_v30  ;;  %v321_v30 = vadd.f32 %v313_v24, %v270_v18 }
 0x146   :  { %v420_v21 = vadd.f32 %v412_v41, %v402_v8  ;;  %v1486_v41 = vmul.f32 %v1221_v2, %v1198_v53 }
 0x147   :  { %v419_v54 = vadd.f32 %v411_v43, %v401_v56  ;;  %v502_v50 = vadd.f32 %v494_v55, %v484_v42  ;;  %861 = vmatpush.msra.mxu3 %v817_v33  ;;  %v364_v43 = vmul.f32 %v1287_v34, %v1348_v15  ;;  %v815_v55 = vld [vmem:[#allocation10 + $0xc0] sm:$0xff]  ;;  %v503_v42 = vadd.f32 %v495_v32, %v485_v11 }
 0x148   :  { %833 = vmatpush.msra.mxu2 %v800_v57  ;;  %v215_v33 = vand.u32 7, %v1232_v6  ;;  %v371_v15 = vadd.f32 %v363_v23, %v320_v17  ;;  %v1928_v17 = vld [vmem:[#allocation16_spill] sm:$0xff]  ;;  %v1934_v57 = vrot.slane %v1377_v22, 1  ;;  %v333_v22 = vpop.permute.xlu2 %332 }
 0x149   :  { %v335_v5 = vpop.permute.xlu1 %334  ;;  %862 = vmatpush.msra.mxu3 %v816_v36  ;;  %v372_v23 = vadd.f32 %v364_v43, %v321_v30  ;;  %v1499_v36 = vmul.f32 %v1224_v3, %v1928_v17  ;;  %v1929_v43 = vrot.slane %v1370_v47, 7  ;;  %v796_v47 = vld [vmem:[#allocation10 + $0x28] sm:$0xff] }
 0x14a   :  { %v343_v29 = vpop.permute.xlu0 %342  ;;  %vm1492_vm7 = vcmp.gt.s32.totalorder %v215_v33, 0  ;;  %vm1513_vm8 = vcmp.lt.s32.totalorder %v215_v33, 7  ;;  %v1933_v33 = vrot.slane %v1372_v49, 7 }
 0x14b   :  { %v1459_v7 = vsel %vm344_vm2, %v335_v5, %v343_v29  ;;  %v352_v10 = vsel %vm344_vm2, %v343_v29, %v335_v5  ;;  %863 = vmatpush.msra.mxu3 %v815_v55  ;;  %v812_v55 = vld [vmem:[#allocation10 + $0xa8] sm:$0xff]  ;;  %v386_v49 = vadd.f32 %v1295_v37, %v372_v23 }
 0x14c   :  { %v1465_v9 = vsel %vm262_vm3, %v352_v10, 0.0  ;;  %v429_v14 = vmul.f32 %v1297_v38, %v1459_v7  ;;  %v512_v46 = vmul.f32 %v1301_v40, %v1459_v7  ;;  %v799_v10 = vld [vmem:[#allocation10 + $0x40] sm:$0xff] }
 0x14d   :  { %v430_v29 = vmul.f32 %v1299_v39, %v1465_v9  ;;  %v513_v56 = vmul.f32 %v1306_v45, %v1465_v9  ;;  %v814_v39 = vld [vmem:[#allocation10 + $0xb8] sm:$0xff]  ;;  %834 = vmatpush.msra.mxu2 %v799_v10 }
 0x14e   :  { %v1477_v5 = vadd.f32 %v429_v14, %v419_v54  ;;  %v1479_v19 = vadd.f32 %v512_v46, %v502_v50  ;;  %v399_v50 = vmul.f32 %v1215_v62, %v1198_v53  ;;  %v797_v14 = vld [vmem:[#allocation10 + $0x30] sm:$0xff]  ;;  %864 = vmatpush.msra.mxu3 %v814_v39  ;;  %v1932_v62 = vrot.slane %v1374_v60, 1 }
 0x14f   :  { %v1482_v8 = vadd.f32 %v430_v29, %v420_v21  ;;  %v1489_v54 = vadd.f32 %v513_v56, %v503_v42  ;;  %v813_v46 = vld [vmem:[#allocation10 + $0xb0] sm:$0xff]  ;;  %v1505_v21 = vmul.f32 %v1212_v61, %v1928_v17  ;;  %835 = vmatpush.msra.mxu2 %v798_v4  ;;  %v385_v39 = vadd.f32 %v1289_v35, %v371_v15 }
 0x150   :  { %v1914_v11 = vrot.slane %v1477_v5, 7  ;;  %v1916_v32 = vrot.slane %v1479_v19, 1  ;;  %v482_v15 = vmul.f32 %v1217_v63, %v1198_v53  ;;  %865 = vmatpush.msra.mxu3 %v813_v46  ;;  %v319_v53 = vmul.f32 %v1269_v25, %v1431_v59  ;;  %v810_v59 = vld [vmem:[#allocation10 + $0x98] sm:$0xff] }
 0x151   :  { %v1915_v24 = vrot.slane %v1482_v8, 7  ;;  %v290_v18 = vpop.permute.xlu1 %289  ;;  %v529_v30 = vrot.slane %v1489_v54, 1  ;;  %836 = vmatpush.msra.mxu2 %v797_v14 }
 0x152   :  { %v282_v29 = vpop.permute.xlu0 %281  ;;  %v454_v56 = vsel %vm447_vm4, %v1914_v11, %v1929_v43  ;;  %v1523_v61 = vsel %vm530_vm5, %v1916_v32, %v1932_v62  ;;  %v483_v43 = vmul.f32 %v1219_v0, %v1928_v17  ;;  %v795_v11 = vld [vmem:[#allocation10 + $0x20] sm:$0xff]  ;;  %v1547_v32 = vadd.s32 24, %v1232_v6  ;;  %866 = vmatpush.msra.mxu3 %v812_v55  ;;  %v794_v17 = vld [vmem:[#allocation10 + $0x18] sm:$0xff] }
 0x153   :  { %v300_v4 = vsel %vm293_vm0, %v290_v18, %v282_v29  ;;  %v460_v42 = vsel %vm1492_vm7, %v454_v56, 0.0  ;;  %v455_v60 = vsel %vm447_vm4, %v1915_v24, %v1933_v33  ;;  %v275_v56 = vmul.f32 %v1221_v2, %v1192_v51  ;;  %v811_v33 = vld [vmem:[#allocation10 + $0xa0] sm:$0xff]  ;;  %837 = vmatpush.msra.mxu2 %v796_v47 }
 0x154   :  { %v306_v62 = vsel %vm259_vm1, %v300_v4, 0.0  ;;  %v468_v24 = vadd.f32 %v460_v42, %v385_v39  ;;  %v1553_v63 = vsel %vm293_vm0, %v282_v29, %v290_v18  ;;  %v543_v0 = vsel %vm1513_vm8, %v1395_v44, 0.0  ;;  %867 = vmatpush.msra.mxu3 %v811_v33  ;;  %v792_v42 = vld [vmem:[#allocation10 + $0x8] sm:$0xff] }
 0x155   :  { %v461_v51 = vsel %vm1492_vm7, %v455_v60, 0.0  ;;  %v276_v2 = vmul.f32 %v1224_v3, %v1194_v52  ;;  %v409_v23 = vmul.f32 %v1250_v12, %v306_v62  ;;  %v492_v18 = vmul.f32 %v1255_v16, %v306_v62  ;;  %838 = vmatpush.msra.mxu2 %v795_v11  ;;  %v793_v16 = vld [vmem:[#allocation10 + $0x10] sm:$0xff]  ;;  %v808_v60 = vld [vmem:[#allocation10 + $0x88] sm:$0xff] }
 0x156   :  { %v1563_v14 = vadd.f32 %v543_v0, %v468_v24  ;;  %v469_v46 = vadd.f32 %v461_v51, %v386_v49  ;;  %v544_v44 = vsel %vm1513_vm8, %v1415_v48, 0.0  ;;  %v1575_v52 = vsel %vm530_vm5, %v529_v30, %v1934_v57  ;;  %v809_v11 = vld [vmem:[#allocation10 + $0x90] sm:$0xff]  ;;  %868 = vmatpush.msra.mxu3 %v810_v59  ;;  %v791_v51 = vld [vmem:[#allocation10] sm:$0xff]  ;;  %v1940_v57 = vld [vmem:[#allocation17_spill] sm:$0xff] }
 0x157   :  { %v318_v3 = vmul.f32 %v1261_v20, %v1425_v1  ;;  %v493_v12 = vmul.f32 %v1271_v26, %v1553_v63  ;;  %v1585_v48 = vadd.s32 16, %v1232_v6  ;;  %v327_v29 = vadd.f32 %v319_v53, %v276_v2  ;;  %839 = vmatpush.msra.mxu2 %v794_v17 }
 0x158   :  { %v1582_v24 = vmul.f32 0.70710677, %v1563_v14  ;;  %v316_v10 = vmul.f32 %v1261_v20, %v306_v62  ;;  %v1588_v4 = vadd.f32 %v544_v44, %v469_v46  ;;  %v236_v1 = vand.u32 7, %v1547_v32  ;;  %869 = vmatpush.msra.mxu3 %v809_v11 }
 0x159   :  { %v417_v26 = vadd.f32 %v409_v23, %v399_v50  ;;  %v500_v20 = vadd.f32 %v492_v18, %v482_v15  ;;  %840 = vmatpush.msra.mxu2 %v793_v16  ;;  %v501_v50 = vadd.f32 %v493_v12, %v483_v43  ;;  %v229_v2 = vand.u32 7, %v1585_v48  ;;  %v1941_v12 = vld [vmem:[#allocation19_spill] sm:$0xff] }
 0x15a   :  { %v341_v39 = vpop.permute.xlu0 %340  ;;  %v1596_v49 = vand.u32 2147483647, %v1582_v24  ;;  %v326_v23 = vadd.f32 %v318_v3, %v275_v56  ;;  %870 = vmatpush.msra.mxu3 %v808_v60  ;;  %v410_v56 = vmul.f32 %v1252_v13, %v1553_v63  ;;  %v1631_v13 = vmul.f32 0.70710677, %v1588_v4 }
 0x15b   :  { %v347_v47 = vsel %vm344_vm2, %v333_v22, %v341_v39  ;;  %v351_v55 = vsel %vm344_vm2, %v341_v39, %v333_v22  ;;  %841 = vmatpush.msra.mxu2 %v792_v42  ;;  %vm1625_vm10 = vcmp.gt.s32.totalorder %v229_v2, 0  ;;  %v1942_v16 = vrot.slane %v1941_v12, 1  ;;  %v1943_v22 = vld [vmem:[#allocation21_spill] sm:$0xff] }
 0x15c   :  { %v358_v62 = vsel %vm262_vm3, %v351_v55, 0.0  ;;  %v427_v33 = vmul.f32 %v1297_v38, %v347_v47  ;;  %v510_v53 = vmul.f32 %v1301_v40, %v347_v47  ;;  %v367_v0 = vmul.f32 %v1282_v31, %v347_v47 }
 0x15d   :  { %v511_v58 = vmul.f32 %v1306_v45, %v358_v62  ;;  %v599_v27 = vmul.f32 0.3275911, %v1596_v49  ;;  %v369_v38 = vmul.f32 %v1282_v31, %v1459_v7  ;;  %v324_v40 = vadd.f32 %v316_v10, %v1486_v41  ;;  %842 = vmatpush.msra.mxu2 %v791_v51 }
 0x15e   :  { %v1605_v17 = vadd.f32 %v427_v33, %v417_v26  ;;  %v518_v15 = vadd.f32 %v510_v53, %v500_v20  ;;  %v1935_v45 = vand.u32 7, %v1277_v28  ;;  %v370_v31 = vmul.f32 %v1287_v34, %v1465_v9  ;;  %v1945_v26 = vld [vmem:[#allocation18_spill] sm:$0xff] }
 0x15f   :  { %v1611_v43 = vadd.f32 %v511_v58, %v501_v50  ;;  %v607_v44 = vadd.f32 1.0, %v599_v27  ;;  %v375_v7 = vadd.f32 %v367_v0, %v324_v40  ;;  %v428_v3 = vmul.f32 %v1940_v57, %v358_v62  ;;  %v1947_v20 = vld [vmem:[#allocation22_spill] sm:$0xff]  ;;  %v1948_v58 = vld [vmem:[#allocation23_spill] sm:$0xff] }
 0x160   :  { %vm1615_vm9 = vcmp.lt.s32.totalorder %v1935_v45, 7  ;;  %v443_v18 = vrot.slane %v1605_v17, 7  ;;  %v526_v46 = vrot.slane %v518_v15, 1  ;;  %v377_v48 = vadd.f32 %v369_v38, %v326_v23 }
 0x161   :  { %v527_v41 = vrot.slane %v1611_v43, 1  ;;  %926 = vrcp.f32 %v607_v44  ;;  %v1944_v10 = vrot.slane %v1943_v22, 1  ;;  %v1946_v47 = vrot.slane %v1945_v26, 7  ;;  %v1956_v26 = vld [vmem:[#allocation20_spill] sm:$0xff] }
 0x162   :  { %v533_v11 = vsel %vm530_vm5, %v1942_v16, %v526_v46  ;;  %v418_v42 = vadd.f32 %v410_v56, %v1505_v21  ;;  %v1651_v60 = vand.u32 2147483647, %v1631_v13  ;;  %v317_v50 = vmul.f32 %v1269_v25, %v1553_v63 }
 0x163   :  { %v545_v9 = vsel %vm1615_vm9, %v533_v11, 0.0  ;;  %v534_v39 = vsel %vm530_vm5, %v1944_v10, %v527_v41  ;;  %v450_v55 = vsel %vm447_vm4, %v1946_v47, %v443_v18  ;;  %v389_v0 = vadd.f32 %v1289_v35, %v375_v7  ;;  %v807_v11 = vld [vmem:[#allocation10 + $0x80] sm:$0xff] }
 0x164   :  { %v1654_v33 = vadd.f32 %v545_v9, %v1947_v20  ;;  %v546_v53 = vsel %vm1615_vm9, %v534_v39, 0.0  ;;  %v464_v21 = vsel %vm1625_vm10, %v450_v55, 0.0  ;;  %v378_v23 = vadd.f32 %v370_v31, %v327_v29  ;;  %871 = vmatpush.msra.mxu3 %v807_v11 }
 0x165   :  { %v1662_v51 = vadd.f32 %v546_v53, %v1948_v58  ;;  %v436_v15 = vadd.f32 %v428_v3, %v418_v42  ;;  %v600_v27 = vmul.f32 0.3275911, %v1651_v60  ;;  %v368_v40 = vmul.f32 %v1287_v34, %v358_v62 }
 0x166   :  { %v1668_v38 = vmul.f32 0.70710677, %v1654_v33  ;;  %v472_v25 = vadd.f32 %v464_v21, %v389_v0  ;;  %v1949_v63 = vrot.slane %v1479_v19, 1  ;;  %vm1681_vm11 = vcmp.lt.s32.totalorder %v229_v2, 7 }
 0x167   :  { %v1672_v43 = vmul.f32 0.70710677, %v1662_v51  ;;  %v927_v59 = vpop.eup %926  ;;  %v608_v56 = vadd.f32 1.0, %v600_v27  ;;  %vm1687_vm12 = vcmp.lt.s32.totalorder %v236_v1, 7  ;;  %v1692_v19 = vadd.f32 %v1289_v35, %v377_v48 }
 0x168   :  { %v531_v45 = vsel %vm530_vm5, %v526_v46, %v1949_v63  ;;  %v1679_v29 = vand.u32 2147483647, %v1668_v38  ;;  %v325_v62 = vadd.f32 %v317_v50, %v1499_v36  ;;  %v623_v46 = vmul.f32 %v927_v59, %v607_v44 }
 0x169   :  { %v1696_v7 = vand.u32 2147483647, %v1672_v43  ;;  %v1699_v2 = vadd.f32 %v1295_v37, %v378_v23  ;;  %v444_v57 = vrot.slane %v436_v15, 7  ;;  %928 = vrcp.f32 %v608_v56 }
 0x16a   :  { %v601_v3 = vmul.f32 0.3275911, %v1679_v29  ;;  %v376_v12 = vadd.f32 %v368_v40, %v325_v62  ;;  %v631_v16 = vsub.f32 2.0, %v623_v46  ;;  %vm1705_vm13 = vcmp.gt.s32.totalorder %v236_v1, 0 }
 0x16b   :  { %v602_v9 = vmul.f32 0.3275911, %v1696_v7  ;;  %v719_v36 = vsub.f32 0.0, %v1596_v49  ;;  %v547_v48 = vsel %vm1681_vm11, %v531_v45, 0.0  ;;  %v549_v22 = vsel %vm1687_vm12, %v1523_v61, 0.0 }
 0x16c   :  { %v609_v44 = vadd.f32 1.0, %v601_v3  ;;  %vm575_vm14 = vcmp.ge.f32.partialorder %v1582_v24, 0.0  ;;  %v1716_v10 = vmul.f32 %v927_v59, %v631_v16  ;;  %v1718_v1 = vadd.f32 %v547_v48, %v472_v25 }
 0x16d   :  { %v610_v32 = vadd.f32 1.0, %v602_v9  ;;  %v1721_v39 = vmul.f32 0.5, %v1563_v14  ;;  %v1957_v47 = vrot.slane %v1956_v26, 7  ;;  %v532_v61 = vsel %vm530_vm5, %v527_v41, %v529_v30 }
 0x16e   :  { %930 = vrcp.f32 %v609_v44  ;;  %v390_v24 = vadd.f32 %v1295_v37, %v376_v12  ;;  %v647_v42 = vmul.f32 1.0614054, %v1716_v10  ;;  %v550_v14 = vsel %vm1687_vm12, %v1575_v52, 0.0 }
 0x16f   :  { %v451_v55 = vsel %vm447_vm4, %v1957_v47, %v444_v57  ;;  %932 = vrcp.f32 %v610_v32  ;;  %v929_v20 = vpop.eup %928  ;;  %v1121_v53 = vmov -1.0   ;;  %v727_v0 = vmul.f32 %v719_v36, %v1596_v49 }
 0x170   :  { %v1737_v50 = vsel %vm575_vm14, 1.0, %v1121_v53  ;;  %v1741_v54 = vmul.f32 0.70710677, %v1718_v1  ;;  %v465_v37 = vsel %vm1625_vm10, %v451_v55, 0.0  ;;  %v655_v30 = vadd.f32 -1.4531521, %v647_v42 }
 0x171   :  { %v624_v41 = vmul.f32 %v929_v20, %v608_v56  ;;  %v720_v58 = vsub.f32 0.0, %v1651_v60  ;;  %v473_v21 = vadd.f32 %v465_v37, %v390_v24  ;;  %v548_v23 = vsel %vm1681_vm11, %v532_v61, 0.0 }
 0x172   :  { %v1747_v52 = vand.u32 2147483647, %v1741_v54  ;;  %v1958_v15 = vrot.slane %v1477_v5, 7  ;;  %v1959_v28 = vrot.slane %v1482_v8, 7  ;;  %v663_v40 = vmul.f32 %v655_v30, %v1716_v10 }
 0x173   :  { %v1763_v25 = vmul.f32 0.5, %v1588_v4  ;;  %v632_v63 = vsub.f32 2.0, %v624_v41  ;;  %v1765_v45 = vadd.f32 %v548_v23, %v473_v21  ;;  %v735_v5 = vmul.f32 1.442695, %v727_v0 }
 0x174   :  { %v448_v49 = vsel %vm447_vm4, %v443_v18, %v1958_v15  ;;  %v449_v27 = vsel %vm447_vm4, %v444_v57, %v1959_v28  ;;  %v931_v59 = vpop.eup %930  ;;  %vm576_vm15 = vcmp.ge.f32.partialorder %v1631_v13, 0.0  ;;  %v603_v17 = vmul.f32 0.3275911, %v1747_v52 }
 0x175   :  { %v466_v8 = vsel %vm1705_vm13, %v448_v49, 0.0  ;;  %v933_v18 = vpop.eup %932  ;;  %v671_v6 = vadd.f32 1.4214138, %v663_v40  ;;  %v1771_v56 = vmul.f32 %v929_v20, %v632_v63  ;;  %v728_v31 = vmul.f32 %v720_v58, %v1651_v60 }
 0x176   :  { %v625_v4 = vmul.f32 %v931_v59, %v609_v44  ;;  %v721_v34 = vsub.f32 0.0, %v1679_v29  ;;  %v626_v62 = vmul.f32 %v933_v18, %v610_v32  ;;  %v611_v46 = vadd.f32 1.0, %v603_v17 }
 0x177   :  { %v1776_v57 = vmul.f32 0.70710677, %v1765_v45  ;;  %v679_v3 = vmul.f32 %v671_v6, %v1716_v10  ;;  %v648_v12 = vmul.f32 1.0614054, %v1771_v56  ;;  %v474_v11 = vadd.f32 %v466_v8, %v1692_v19 }
 0x178   :  { %v633_v16 = vsub.f32 2.0, %v625_v4  ;;  %v634_v9 = vsub.f32 2.0, %v626_v62  ;;  %v722_v36 = vsub.f32 0.0, %v1696_v7  ;;  %934 = vrcp.f32 %v611_v46 }
 0x179   :  { %v467_v60 = vsel %vm1705_vm13, %v449_v27, 0.0  ;;  %v687_v44 = vadd.f32 -0.28449672, %v679_v3  ;;  %936 = vpow2.f32 %v735_v5  ;;  %v656_v48 = vadd.f32 -1.4531521, %v648_v12 }
 0x17a   :  { %v1784_v32 = vmul.f32 %v931_v59, %v633_v16  ;;  %v737_v26 = vmul.f32 1.442695, %v728_v31  ;;  %v1786_v47 = vmul.f32 %v933_v18, %v634_v9  ;;  %v1789_v55 = vand.u32 2147483647, %v1776_v57 }
 0x17b   :  { %v1791_v61 = vadd.f32 %v549_v22, %v474_v11  ;;  %v695_v19 = vmul.f32 %v687_v44, %v1716_v10  ;;  %v664_v24 = vmul.f32 %v656_v48, %v1771_v56  ;;  %v475_v42 = vadd.f32 %v467_v60, %v1699_v2 }
 0x17c   :  { %v649_v35 = vmul.f32 1.0614054, %v1784_v32  ;;  %v729_v20 = vmul.f32 %v721_v34, %v1679_v29  ;;  %v650_v0 = vmul.f32 1.0614054, %v1786_v47  ;;  %v730_v37 = vmul.f32 %v722_v36, %v1696_v7 }
 0x17d   :  { %v604_v30 = vmul.f32 0.3275911, %v1789_v55  ;;  %v703_v41 = vadd.f32 0.2548296, %v695_v19  ;;  %v672_v58 = vadd.f32 1.4214138, %v664_v24  ;;  %v1801_v21 = vadd.f32 %v550_v14, %v475_v42 }
 0x17e   :  { %v657_v22 = vadd.f32 -1.4531521, %v649_v35  ;;  %v935_v23 = vpop.eup %934  ;;  %v1806_v15 = vsel %vm576_vm15, 1.0, %v1121_v53  ;;  %v658_v2 = vadd.f32 -1.4531521, %v650_v0  ;;  %v723_v31 = vsub.f32 0.0, %v1747_v52 }
 0x17f   :  { %v612_v49 = vadd.f32 1.0, %v604_v30  ;;  %v1809_v29 = vmul.f32 0.70710677, %v1791_v61  ;;  %v937_v28 = vpop.eup %936  ;;  %v711_v7 = vmul.f32 %v703_v41, %v1716_v10  ;;  %v680_v27 = vmul.f32 %v672_v58, %v1771_v56 }
 0x180   :  { %v665_v40 = vmul.f32 %v657_v22, %v1784_v32  ;;  %v627_v14 = vmul.f32 %v935_v23, %v611_v46  ;;  %v739_v63 = vmul.f32 1.442695, %v729_v20  ;;  %v666_v59 = vmul.f32 %v658_v2, %v1786_v47 }
 0x181   :  { %v741_v5 = vmul.f32 1.442695, %v730_v37  ;;  %938 = vrcp.f32 %v612_v49  ;;  %v751_v13 = vmul.f32 %v937_v28, %v711_v7  ;;  %v688_v17 = vadd.f32 -0.28449672, %v680_v27 }
 0x182   :  { %v673_v8 = vadd.f32 1.4214138, %v665_v40  ;;  %v635_v18 = vsub.f32 2.0, %v627_v14  ;;  %940 = vpow2.f32 %v737_v26  ;;  %v674_v6 = vadd.f32 1.4214138, %v666_v59 }
 0x183   :  { %v1817_v10 = vand.u32 2147483647, %v1809_v29  ;;  %v759_v4 = vsub.f32 1.0, %v751_v13  ;;  %v696_v34 = vmul.f32 %v688_v17, %v1771_v56  ;;  %vm577_vm0 = vcmp.ge.f32.partialorder %v1668_v38, 0.0 }
 0x184   :  { %v681_v62 = vmul.f32 %v673_v8, %v1784_v32  ;;  %v1821_v46 = vmul.f32 %v935_v23, %v635_v18  ;;  %942 = vpow2.f32 %v739_v63  ;;  %v682_v3 = vmul.f32 %v674_v6, %v1786_v47 }
 0x185   :  { %v605_v12 = vmul.f32 0.3275911, %v1817_v10  ;;  %v767_v16 = vmul.f32 %v759_v4, %v1737_v50  ;;  %v704_v11 = vadd.f32 0.2548296, %v696_v34  ;;  %944 = vpow2.f32 %v741_v5 }
 0x186   :  { %v689_v9 = vadd.f32 -0.28449672, %v681_v62  ;;  %v651_v36 = vmul.f32 1.0614054, %v1821_v46  ;;  %v690_v44 = vadd.f32 -0.28449672, %v682_v3  ;;  %v731_v48 = vmul.f32 %v723_v31, %v1747_v52 }
 0x187   :  { %v939_v60 = vpop.eup %938  ;;  %v613_v26 = vadd.f32 1.0, %v605_v12  ;;  %v775_v19 = vadd.f32 1.0, %v767_v16  ;;  %v712_v24 = vmul.f32 %v704_v11, %v1771_v56  ;;  %v1833_v37 = vmul.f32 0.70710677, %v1801_v21 }
 0x188   :  { %v697_v35 = vmul.f32 %v689_v9, %v1784_v32  ;;  %v659_v42 = vadd.f32 -1.4531521, %v651_v36  ;;  %v941_v20 = vpop.eup %940  ;;  %v698_v0 = vmul.f32 %v690_v44, %v1786_v47  ;;  %v628_v50 = vmul.f32 %v939_v60, %v612_v49 }
 0x189   :  { %946 = vrcp.f32 %v613_v26  ;;  %v783_v30 = vmul.f32 %v775_v19, %v1721_v39  ;;  %v752_v41 = vmul.f32 %v941_v20, %v712_v24  ;;  %vm578_vm1 = vcmp.ge.f32.partialorder %v1672_v43, 0.0 }
 0x18a   :  { %v705_v58 = vadd.f32 0.2548296, %v697_v35  ;;  %v667_v52 = vmul.f32 %v659_v42, %v1821_v46  ;;  %v943_v22 = vpop.eup %942  ;;  %v706_v56 = vadd.f32 0.2548296, %v698_v0  ;;  %v743_v23 = vmul.f32 1.442695, %v731_v48 }
 0x18b   :  { %v636_v2 = vsub.f32 2.0, %v628_v50  ;;  %843 = vmatmul.f32.vlgmr.msra.gmra.mxu2 %v783_v30  ;;  %v760_v28 = vsub.f32 1.0, %v752_v41  ;;  %v585_v49 = vsel %vm577_vm0, 1.0, %v1121_v53  ;;  %v945_v39 = vpop.eup %944  ;;  %v724_v63 = vsub.f32 0.0, %v1789_v55 }
 0x18c   :  { %v713_v7 = vmul.f32 %v705_v58, %v1784_v32  ;;  %v675_v27 = vadd.f32 1.4214138, %v667_v52  ;;  %v714_v40 = vmul.f32 %v706_v56, %v1786_v47  ;;  %v1847_v59 = vand.u32 2147483647, %v1833_v37 }
 0x18d   :  { %v1843_v14 = vmul.f32 %v939_v60, %v636_v2  ;;  %v768_v5 = vmul.f32 %v760_v28, %v1806_v15  ;;  %v586_v38 = vsel %vm578_vm1, 1.0, %v1121_v53  ;;  %948 = vpow2.f32 %v743_v23 }
 0x18e   :  { %v753_v13 = vmul.f32 %v943_v22, %v713_v7  ;;  %v683_v32 = vmul.f32 %v675_v27, %v1821_v46  ;;  %v754_v8 = vmul.f32 %v945_v39, %v714_v40  ;;  %v606_v18 = vmul.f32 0.3275911, %v1847_v59 }
 0x18f   :  { %v947_v17 = vpop.eup %946  ;;  %v652_v47 = vmul.f32 1.0614054, %v1843_v14  ;;  %v776_v6 = vadd.f32 1.0, %v768_v5  ;;  %v732_v3 = vmul.f32 %v724_v63, %v1789_v55  ;;  %v561_v44 = vmul.f32 0.5, %v1654_v33 }
 0x190   :  { %v761_v31 = vsub.f32 1.0, %v753_v13  ;;  %v691_v4 = vadd.f32 -0.28449672, %v683_v32  ;;  %v629_v34 = vmul.f32 %v947_v17, %v613_v26  ;;  %v762_v62 = vsub.f32 1.0, %v754_v8 }
 0x191   :  { %v660_v15 = vadd.f32 -1.4531521, %v652_v47  ;;  %v614_v12 = vadd.f32 1.0, %v606_v18  ;;  %v784_v43 = vmul.f32 %v776_v6, %v1763_v25  ;;  %v562_v55 = vmul.f32 0.5, %v1662_v51 }
 0x192   :  { %v769_v16 = vmul.f32 %v761_v31, %v585_v49  ;;  %v699_v11 = vmul.f32 %v691_v4, %v1821_v46  ;;  %v637_v9 = vsub.f32 2.0, %v629_v34  ;;  %v770_v36 = vmul.f32 %v762_v62, %v586_v38 }
 0x193   :  { %v668_v60 = vmul.f32 %v660_v15, %v1843_v14  ;;  %950 = vrcp.f32 %v614_v12  ;;  %872 = vmatmul.f32.vlgmr.msra.gmra.mxu3 %v784_v43  ;;  %v949_v24 = vpop.eup %948  ;;  %v725_v25 = vsub.f32 0.0, %v1817_v10  ;;  %v745_v50 = vmul.f32 1.442695, %v732_v3 }
 0x194   :  { %v777_v48 = vadd.f32 1.0, %v769_v16  ;;  %v707_v26 = vadd.f32 0.2548296, %v699_v11  ;;  %v645_v19 = vmul.f32 %v947_v17, %v637_v9  ;;  %v778_v35 = vadd.f32 1.0, %v770_v36 }
 0x195   :  { %v676_v42 = vadd.f32 1.4214138, %v668_v60  ;;  %vm579_vm2 = vcmp.ge.f32.partialorder %v1741_v54, 0.0  ;;  %v733_v51 = vmul.f32 %v725_v25, %v1817_v10  ;;  %952 = vpow2.f32 %v745_v50 }
 0x196   :  { %v785_v20 = vmul.f32 %v777_v48, %v561_v44  ;;  %v715_v0 = vmul.f32 %v707_v26, %v1821_v46  ;;  %v653_v30 = vmul.f32 1.0614054, %v645_v19  ;;  %v786_v58 = vmul.f32 %v778_v35, %v562_v55 }
 0x197   :  { %v684_v41 = vmul.f32 %v676_v42, %v1843_v14  ;;  %v587_v46 = vsel %vm579_vm2, 1.0, %v1121_v53  ;;  %v747_v54 = vmul.f32 1.442695, %v733_v51  ;;  %v563_v63 = vmul.f32 0.5, %v1718_v1 }
 0x198   :  { %846 = vmatmul.f32.gmra.mxu2 %v785_v20  ;;  %v755_v33 = vmul.f32 %v949_v24, %v715_v0  ;;  %v661_v52 = vadd.f32 -1.4531521, %v653_v30  ;;  %v726_v32 = vsub.f32 0.0, %v1847_v59  ;;  %vm580_vm3 = vcmp.ge.f32.partialorder %v1776_v57, 0.0 }
 0x199   :  { %v951_v22 = vpop.eup %950  ;;  %v692_v56 = vadd.f32 -0.28449672, %v684_v41  ;;  %954 = vpow2.f32 %v747_v54  ;;  %v588_v62 = vsel %vm580_vm3, 1.0, %v1121_v53  ;;  %v564_v11 = vmul.f32 0.5, %v1765_v45 }
 0x19a   :  { %v763_v23 = vsub.f32 1.0, %v755_v33  ;;  %v669_v2 = vmul.f32 %v661_v52, %v645_v19  ;;  %v630_v28 = vmul.f32 %v951_v22, %v614_v12  ;;  %v734_v1 = vmul.f32 %v726_v32, %v1847_v59 }
 0x19b   :  { %v700_v49 = vmul.f32 %v692_v56, %v1843_v14  ;;  %875 = vmatmul.f32.gmra.mxu3 %v786_v58  ;;  %v953_v17 = vpop.eup %952  ;;  %vm581_vm4 = vcmp.ge.f32.partialorder %v1809_v29, 0.0  ;;  %vm582_vm5 = vcmp.ge.f32.partialorder %v1833_v37, 0.0  ;;  %v566_v41 = vmul.f32 0.5, %v1801_v21 }
 0x19c   :  { %v771_v7 = vmul.f32 %v763_v23, %v587_v46  ;;  %v677_v27 = vadd.f32 1.4214138, %v669_v2  ;;  %v638_v39 = vsub.f32 2.0, %v630_v28  ;;  %v749_v57 = vmul.f32 1.442695, %v734_v1 }
 0x19d   :  { %v708_v40 = vadd.f32 0.2548296, %v700_v49  ;;  %v589_v59 = vsel %vm581_vm4, 1.0, %v1121_v53  ;;  %v590_v50 = vsel %vm582_vm5, 1.0, %v1121_v53 }
 0x19e   :  { %v779_v5 = vadd.f32 1.0, %v771_v7  ;;  %v685_v13 = vmul.f32 %v677_v27, %v645_v19  ;;  %v646_v38 = vmul.f32 %v951_v22, %v638_v39  ;;  %956 = vpow2.f32 %v749_v57 }
 0x19f   :  { %v716_v10 = vmul.f32 %v708_v40, %v1843_v14  ;;  %v955_v16 = vpop.eup %954 }
 0x1a0   :  { %v787_v8 = vmul.f32 %v779_v5, %v563_v63  ;;  %v693_v47 = vadd.f32 -0.28449672, %v685_v13  ;;  %v654_v18 = vmul.f32 1.0614054, %v646_v38 }
 0x1a1   :  { %v756_v6 = vmul.f32 %v953_v17, %v716_v10 }
 0x1a2   :  { %849 = vmatmul.f32.gmra.mxu2 %v787_v8  ;;  %v701_v31 = vmul.f32 %v693_v47, %v645_v19  ;;  %v662_v4 = vadd.f32 -1.4531521, %v654_v18 }
 0x1a3   :  { %v764_v34 = vsub.f32 1.0, %v756_v6 }
 0x1a4   :  { %v709_v15 = vadd.f32 0.2548296, %v701_v31  ;;  %v670_v14 = vmul.f32 %v662_v4, %v646_v38  ;;  %v957_v20 = vpop.eup %956 }
 0x1a5   :  { %v772_v3 = vmul.f32 %v764_v34, %v588_v62 }
 0x1a6   :  { %v717_v12 = vmul.f32 %v709_v15, %v645_v19  ;;  %v678_v43 = vadd.f32 1.4214138, %v670_v14  ;;  %v565_v19 = vmul.f32 0.5, %v1791_v61  ;;  %v925_v61 = vld [vmem:[%s1897_s6] ss:$0 sm:$0xff] }
 0x1a7   :  { %v780_v9 = vadd.f32 1.0, %v772_v3 }
 0x1a8   :  { %v757_v36 = vmul.f32 %v955_v16, %v717_v12  ;;  %v686_v60 = vmul.f32 %v678_v43, %v646_v38 }
 0x1a9   :  { %v788_v44 = vmul.f32 %v780_v9, %v564_v11 }
 0x1aa   :  { %v765_v48 = vsub.f32 1.0, %v757_v36  ;;  %v694_v26 = vadd.f32 -0.28449672, %v686_v60 }
 0x1ab   :  { %878 = vmatmul.f32.gmra.mxu3 %v788_v44 }
 0x1ac   :  { %v773_v24 = vmul.f32 %v765_v48, %v589_v59  ;;  %v702_v55 = vmul.f32 %v694_v26, %v646_v38 }
 0x1ae   :  { %v781_v35 = vadd.f32 1.0, %v773_v24  ;;  %v710_v42 = vadd.f32 0.2548296, %v702_v55 }
 0x1b0   :  { %v789_v45 = vmul.f32 %v781_v35, %v565_v19  ;;  %v718_v25 = vmul.f32 %v710_v42, %v646_v38 }
 0x1b2   :  { %852 = vmatmul.f32.gmra.mxu2 %v789_v45  ;;  %v758_v29 = vmul.f32 %v957_v20, %v718_v25 }
 0x1b4   :  { %v766_v0 = vsub.f32 1.0, %v758_v29 }
 0x1b6   :  { %v774_v30 = vmul.f32 %v766_v0, %v590_v50 }
 0x1b8   :  { %v782_v58 = vadd.f32 1.0, %v774_v30 }
 0x1ba   :  { %v790_v33 = vmul.f32 %v782_v58, %v566_v41 }
 0x1bc   :  { %881 = vmatmul.f32.gmra.mxu3 %v790_v33 }
 0x20e   :  { %v844_v52 = vpop.f32.mrf.mxu2 }
 0x20f   :  { %v845_v22 = vadd.f32 %v925_v61, %v844_v52 }
 0x216   :  { %v873_v56 = vpop.f32.mrf.mxu3 }
 0x217   :  { %v874_v51 = vadd.f32 %v873_v56, %v845_v22 }
 0x219   :  { %885 = vst [vmem:[#allocation11] sm:$0xff] %v874_v51 }
 0x21b   :  { %v847_v37 = vpop.f32.mrf.mxu2 }
 0x21c   :  { %v848_v23 = vadd.f32 %v925_v61, %v847_v37 }
 0x21e   :  { %v876_v2 = vpop.f32.mrf.mxu3 }
 0x21f   :  { %v877_v28 = vadd.f32 %v876_v2, %v848_v23 }
 0x221   :  { %886 = vst [vmem:[#allocation11 + $0x8] sm:$0xff] %v877_v28 }
 0x225   :  { %v850_v53 = vpop.f32.mrf.mxu2 }
 0x226   :  { %v851_v46 = vadd.f32 %v925_v61, %v850_v53 }
 0x22e   :  { %v879_v21 = vpop.f32.mrf.mxu3 }
 0x22f   :  { %v880_v49 = vadd.f32 %v879_v21, %v851_v46 }
 0x231   :  { %887 = vst [vmem:[#allocation11 + $0x10] sm:$0xff] %v880_v49 }
 0x235   :  { %v853_v7 = vpop.f32.mrf.mxu2 }
 0x236   :  { %v854_v27 = vadd.f32 %v925_v61, %v853_v7 }
 0x23f   :  { %v882_v39 = vpop.f32.mrf.mxu3 }
 0x240   :  { %v883_v40 = vadd.f32 %v882_v39, %v854_v27 }
 0x242   :  { %888 = vst [vmem:[#allocation11 + $0x18] sm:$0xff] %v883_v40 }
 0x243   :  { %901 = dma.vmem_to_hbm [thread:$0]  %s894_s8, 512, %s896_s10, [#allocation4], %s1115_s19, %s1115_s19, %s1116_s20  }
 0x244   :  { %1108 = dma.done.wait [#allocation4], 512  }
 0x245   :  { %1109 = vsyncadd [#allocation4], 4294966784 }
 0x246   :  { %906 = vsyncpa [#allocation3], 1 }
 0x247   :  { %907 = vsyncpa [#allocation6], 1 }
 0x248   :  { %908 = vsyncpa [#allocation9], 1 }
 0x249   :  { %909 = vsyncpa [#allocation4], 1 }

</bundles_post_ra>
